<compile_context>
chip_gen: v7x
topology: tpu7x:2x2x1
jax: 0.10.0
libtpu: 0.0.40
codegen_flags: <defaults>
</compile_context>

<pallas_src>
from functools import partial

import jax
import jax.numpy as jnp
from jax.experimental import pallas as pl
from jax.experimental.pallas import tpu as pltpu

# ----- problem sizes (small, deterministic) ---------------------------------
B = 2            # batch
F = 128          # feature / hidden width (lane-aligned)
W = 8            # branching_width
MAX_DEPTH = 3    # max_depth
BEAM_WIDTH = 4   # TODO(synk): beam_width is forwarded to `fitness` in the torch
                 # module but the reference forward never prunes; our concrete
                 # linear fitness ignores it as well.
M_PAD = 8        # batch padded to a full sublane group (8 rows of f32)


def _quantum_search_kernel(x_ref, wt_ref, bt_ref, vfb_ref, o_ref, *, approx_recip):
    """x:(8,F) f32   wt:(F,W*F)   bt:(1,W*F) f32   vfb:(W*F,W)  ->  o:(8,F) f32."""
    beam = x_ref[...]          # (8, F)   f32
    wt = wt_ref[...]           # (F, W*F) dot dtype (bf16 on the perf path)
    bt = bt_ref[...]           # (1, W*F) f32
    vfb = vfb_ref[...]         # (W*F, W) dot dtype
    dot_dtype = wt.dtype

    # Static unroll of the fixed-trip-count depth loop (LLO sees the whole body).
    for _ in range(MAX_DEPTH):
        # --- fused transition: one MXU dot, f32 accumulate, one tanh ---------
        cand = jnp.tanh(
            jnp.dot(beam.astype(dot_dtype), wt,
                    preferred_element_type=jnp.float32) + bt)        # (8, W*F)

        # --- fused fitness: one dot against block-diagonal weights -----------
        # (the constant bias cf cancels in the softmax, so it is omitted)
        scores = jnp.dot(cand.astype(dot_dtype), vfb,
                         preferred_element_type=jnp.float32)         # (8, W)

        # --- softmax over the W candidates (dim=1 in torch) -------------------
        m = jnp.max(scores, axis=1, keepdims=True)
        e = jnp.exp(scores - m)
        inv = pl.reciprocal(jnp.sum(e, axis=1, keepdims=True),
                            approx=approx_recip)                     # (8, 1)
        p = e * inv                                                  # (8, W)

        # --- weighted sum of candidates + residual beam -----------------------
        # Slices of `cand` are at vreg (128-lane) boundaries: pure VPU work.
        new_beam = beam
        for w in range(W):
            new_beam = new_beam + p[:, w:w + 1] * cand[:, w * F:(w + 1) * F]
        beam = new_beam

    # beam.mean(0) over the trivial leading dim of size 1 is the identity.
    o_ref[...] = beam


def quantum_search(x, wt, bt, vf, *, dot_dtype=jnp.bfloat16, approx_recip=True):
    """Wrapper: pads batch to 8 sublanes, builds block-diagonal fitness weights."""
    b_in, f_in = x.shape

    # Pad batch to 8 rows so all vector ops / stores are full-width (unmasked).
    x_pad = jnp.zeros((M_PAD, f_in), jnp.float32).at[:b_in].set(
        x.astype(jnp.float32))

    # Block-diagonal fitness weights: (W*F, W); column w holds vf in rows
    # w*F : (w+1)*F.  Lets one matmul score all W candidates per row.
    eye = jnp.eye(W, dtype=jnp.float32)                      # (W, W)
    vf_block = (eye[:, None, :] * vf[None, :, 0:1]).reshape(W * F, W)

    kernel = partial(_quantum_search_kernel, approx_recip=approx_recip)
    out_pad = pl.pallas_call(
        kernel,
        out_shape=jax.ShapeDtypeStruct((M_PAD, f_in), jnp.float32),
        in_specs=[pl.BlockSpec(memory_space=pltpu.MemorySpace.VMEM)] * 4,
        out_specs=pl.BlockSpec(memory_space=pltpu.MemorySpace.VMEM),
    )(x_pad,
      wt.astype(dot_dtype),
      bt.astype(jnp.float32),
      vf_block.astype(dot_dtype))
    return out_pad[:b_in]


def reference(x, wt, bt, vf, cf):
    """Pure-JAX (f32) mirror of QuantumSearch.forward with the same concrete heads."""
    beam = x[None, ...]                                            # (1, B, F)
    for _ in range(MAX_DEPTH):
        b = beam[0]                                                # (B, F)
        cand = jnp.tanh(b @ wt + bt).reshape(B, W, F)              # (B, W, F)
        scores = jnp.einsum('bwf,fo->bwo', cand, vf) + cf[0, 0]    # (B, W, 1)
        p = jax.nn.softmax(scores, axis=1)                         # (B, W, 1)
        mixed = jnp.sum(p * cand, axis=1)                          # (B, F)
        beam = mixed + beam                                        # (1, B, F)
    return beam.mean(0)                                            # (B, F)


if __name__ == "__main__":
    key = jax.random.PRNGKey(0)
    kx, kw, kb, kv, kc = jax.random.split(key, 5)

    x = jax.random.normal(kx, (B, F), dtype=jnp.float32)
    wt = 0.05 * jax.random.normal(kw, (F, W * F), dtype=jnp.float32)
    bt = 0.05 * jax.random.normal(kb, (1, W * F), dtype=jnp.float32)
    vf = 0.05 * jax.random.normal(kv, (F, 1), dtype=jnp.float32)
    cf = 0.05 * jax.random.normal(kc, (1, 1), dtype=jnp.float32)

    ref = reference(x, wt, bt, vf, cf)

    # 1) Strict correctness check: f32 MXU operands, exact reciprocal.
    out_f32 = jax.block_until_ready(
        quantum_search(x, wt, bt, vf, dot_dtype=jnp.float32, approx_recip=False))
    assert out_f32.shape == (B, F)
    assert jnp.allclose(out_f32, ref, rtol=1e-5, atol=1e-5), (
        f"f32 path max abs err {jnp.max(jnp.abs(out_f32 - ref))}")

    # 2) Performance path (bf16 MXU operands, f32 accumulation, approx recip):
    #    looser tolerance, as recommended, since weights are rounded to bf16.
    out_bf16 = jax.block_until_ready(quantum_search(x, wt, bt, vf))
    assert out_bf16.shape == (B, F)
    assert jnp.allclose(out_bf16, ref, rtol=5e-2, atol=5e-2), (
        f"bf16 path max abs err {jnp.max(jnp.abs(out_bf16 - ref))}")

    print("KERNEL_OK")
</pallas_src>

<mosaic_0001>
module attributes {stable_mosaic.version = 11 : i64} {
  func.func @_quantum_search_kernel(%arg0: memref<8x128xf32, #tpu.memory_space<vmem>>, %arg1: memref<128x1024xf32, #tpu.memory_space<vmem>>, %arg2: memref<1x1024xf32, #tpu.memory_space<vmem>>, %arg3: memref<1024x8xf32, #tpu.memory_space<vmem>>, %arg4: memref<8x128xf32, #tpu.memory_space<vmem>>) attributes {dimension_semantics = [], scalar_prefetch = 0 : i64, scratch_operands = 0 : i64, tpu.core_type = #tpu.core_type<tc>} {
    %c0 = arith.constant 0 : index
    %c0_0 = arith.constant 0 : index
    %0 = vector.load %arg0[%c0, %c0_0] : memref<8x128xf32, #tpu.memory_space<vmem>>, vector<8x128xf32>
    %c0_1 = arith.constant 0 : index
    %c0_2 = arith.constant 0 : index
    %1 = vector.load %arg1[%c0_1, %c0_2] : memref<128x1024xf32, #tpu.memory_space<vmem>>, vector<128x1024xf32>
    %c0_3 = arith.constant 0 : index
    %c0_4 = arith.constant 0 : index
    %2 = vector.load %arg2[%c0_3, %c0_4] : memref<1x1024xf32, #tpu.memory_space<vmem>>, vector<1x1024xf32>
    %c0_5 = arith.constant 0 : index
    %c0_6 = arith.constant 0 : index
    %3 = vector.load %arg3[%c0_5, %c0_6] : memref<1024x8xf32, #tpu.memory_space<vmem>>, vector<1024x8xf32>
    %cst = arith.constant dense<0.000000e+00> : vector<8x1024xf32>
    %4 = tpu.matmul %0, %1, %cst {dimension_numbers = #tpu.dot_dimension_numbers<[1], [0], [0], [1], [0, 0, 1, 1], [], []>} : vector<8x128xf32>, vector<128x1024xf32>, vector<8x1024xf32> -> vector<8x1024xf32>
    %5 = vector.broadcast %2 : vector<1x1024xf32> to vector<8x1024xf32>
    %6 = arith.addf %4, %5 : vector<8x1024xf32>
    %7 = math.tanh %6 : vector<8x1024xf32>
    %cst_7 = arith.constant dense<0.000000e+00> : vector<8x8xf32>
    %8 = tpu.matmul %7, %3, %cst_7 {dimension_numbers = #tpu.dot_dimension_numbers<[1], [0], [0], [1], [0, 0, 1, 1], [], []>} : vector<8x1024xf32>, vector<1024x8xf32>, vector<8x8xf32> -> vector<8x8xf32>
    %cst_8 = arith.constant dense<0xFF800000> : vector<8xf32>
    %9 = vector.multi_reduction <maximumf>, %8, %cst_8 [1] : vector<8x8xf32> to vector<8xf32>
    %10 = vector.shape_cast %9 : vector<8xf32> to vector<8x1xf32>
    %11 = vector.broadcast %10 : vector<8x1xf32> to vector<8x8xf32>
    %12 = arith.subf %8, %11 : vector<8x8xf32>
    %13 = math.exp %12 : vector<8x8xf32>
    %cst_9 = arith.constant dense<0.000000e+00> : vector<8xf32>
    %14 = vector.multi_reduction <add>, %13, %cst_9 [1] : vector<8x8xf32> to vector<8xf32>
    %15 = vector.shape_cast %14 : vector<8xf32> to vector<8x1xf32>
    %16 = tpu.reciprocal %15 : vector<8x1xf32> -> vector<8x1xf32>
    %17 = vector.broadcast %16 : vector<8x1xf32> to vector<8x8xf32>
    %18 = arith.mulf %13, %17 : vector<8x8xf32>
    %19 = vector.extract_strided_slice %18 {offsets = [0, 0], sizes = [8, 1], strides = [1, 1]} : vector<8x8xf32> to vector<8x1xf32>
    %20 = vector.extract_strided_slice %7 {offsets = [0, 0], sizes = [8, 128], strides = [1, 1]} : vector<8x1024xf32> to vector<8x128xf32>
    %21 = vector.broadcast %19 : vector<8x1xf32> to vector<8x128xf32>
    %22 = arith.mulf %21, %20 : vector<8x128xf32>
    %23 = arith.addf %0, %22 : vector<8x128xf32>
    %24 = vector.extract_strided_slice %18 {offsets = [0, 1], sizes = [8, 1], strides = [1, 1]} : vector<8x8xf32> to vector<8x1xf32>
    %25 = vector.extract_strided_slice %7 {offsets = [0, 128], sizes = [8, 128], strides = [1, 1]} : vector<8x1024xf32> to vector<8x128xf32>
    %26 = vector.broadcast %24 : vector<8x1xf32> to vector<8x128xf32>
    %27 = arith.mulf %26, %25 : vector<8x128xf32>
    %28 = arith.addf %23, %27 : vector<8x128xf32>
    %29 = vector.extract_strided_slice %18 {offsets = [0, 2], sizes = [8, 1], strides = [1, 1]} : vector<8x8xf32> to vector<8x1xf32>
    %30 = vector.extract_strided_slice %7 {offsets = [0, 256], sizes = [8, 128], strides = [1, 1]} : vector<8x1024xf32> to vector<8x128xf32>
    %31 = vector.broadcast %29 : vector<8x1xf32> to vector<8x128xf32>
    %32 = arith.mulf %31, %30 : vector<8x128xf32>
    %33 = arith.addf %28, %32 : vector<8x128xf32>
    %34 = vector.extract_strided_slice %18 {offsets = [0, 3], sizes = [8, 1], strides = [1, 1]} : vector<8x8xf32> to vector<8x1xf32>
    %35 = vector.extract_strided_slice %7 {offsets = [0, 384], sizes = [8, 128], strides = [1, 1]} : vector<8x1024xf32> to vector<8x128xf32>
    %36 = vector.broadcast %34 : vector<8x1xf32> to vector<8x128xf32>
    %37 = arith.mulf %36, %35 : vector<8x128xf32>
    %38 = arith.addf %33, %37 : vector<8x128xf32>
    %39 = vector.extract_strided_slice %18 {offsets = [0, 4], sizes = [8, 1], strides = [1, 1]} : vector<8x8xf32> to vector<8x1xf32>
    %40 = vector.extract_strided_slice %7 {offsets = [0, 512], sizes = [8, 128], strides = [1, 1]} : vector<8x1024xf32> to vector<8x128xf32>
    %41 = vector.broadcast %39 : vector<8x1xf32> to vector<8x128xf32>
    %42 = arith.mulf %41, %40 : vector<8x128xf32>
    %43 = arith.addf %38, %42 : vector<8x128xf32>
    %44 = vector.extract_strided_slice %18 {offsets = [0, 5], sizes = [8, 1], strides = [1, 1]} : vector<8x8xf32> to vector<8x1xf32>
    %45 = vector.extract_strided_slice %7 {offsets = [0, 640], sizes = [8, 128], strides = [1, 1]} : vector<8x1024xf32> to vector<8x128xf32>
    %46 = vector.broadcast %44 : vector<8x1xf32> to vector<8x128xf32>
    %47 = arith.mulf %46, %45 : vector<8x128xf32>
    %48 = arith.addf %43, %47 : vector<8x128xf32>
    %49 = vector.extract_strided_slice %18 {offsets = [0, 6], sizes = [8, 1], strides = [1, 1]} : vector<8x8xf32> to vector<8x1xf32>
    %50 = vector.extract_strided_slice %7 {offsets = [0, 768], sizes = [8, 128], strides = [1, 1]} : vector<8x1024xf32> to vector<8x128xf32>
    %51 = vector.broadcast %49 : vector<8x1xf32> to vector<8x128xf32>
    %52 = arith.mulf %51, %50 : vector<8x128xf32>
    %53 = arith.addf %48, %52 : vector<8x128xf32>
    %54 = vector.extract_strided_slice %18 {offsets = [0, 7], sizes = [8, 1], strides = [1, 1]} : vector<8x8xf32> to vector<8x1xf32>
    %55 = vector.extract_strided_slice %7 {offsets = [0, 896], sizes = [8, 128], strides = [1, 1]} : vector<8x1024xf32> to vector<8x128xf32>
    %56 = vector.broadcast %54 : vector<8x1xf32> to vector<8x128xf32>
    %57 = arith.mulf %56, %55 : vector<8x128xf32>
    %58 = arith.addf %53, %57 : vector<8x128xf32>
    %cst_10 = arith.constant dense<0.000000e+00> : vector<8x1024xf32>
    %59 = tpu.matmul %58, %1, %cst_10 {dimension_numbers = #tpu.dot_dimension_numbers<[1], [0], [0], [1], [0, 0, 1, 1], [], []>} : vector<8x128xf32>, vector<128x1024xf32>, vector<8x1024xf32> -> vector<8x1024xf32>
    %60 = vector.broadcast %2 : vector<1x1024xf32> to vector<8x1024xf32>
    %61 = arith.addf %59, %60 : vector<8x1024xf32>
    %62 = math.tanh %61 : vector<8x1024xf32>
    %cst_11 = arith.constant dense<0.000000e+00> : vector<8x8xf32>
    %63 = tpu.matmul %62, %3, %cst_11 {dimension_numbers = #tpu.dot_dimension_numbers<[1], [0], [0], [1], [0, 0, 1, 1], [], []>} : vector<8x1024xf32>, vector<1024x8xf32>, vector<8x8xf32> -> vector<8x8xf32>
    %cst_12 = arith.constant dense<0xFF800000> : vector<8xf32>
    %64 = vector.multi_reduction <maximumf>, %63, %cst_12 [1] : vector<8x8xf32> to vector<8xf32>
    %65 = vector.shape_cast %64 : vector<8xf32> to vector<8x1xf32>
    %66 = vector.broadcast %65 : vector<8x1xf32> to vector<8x8xf32>
    %67 = arith.subf %63, %66 : vector<8x8xf32>
    %68 = math.exp %67 : vector<8x8xf32>
    %cst_13 = arith.constant dense<0.000000e+00> : vector<8xf32>
    %69 = vector.multi_reduction <add>, %68, %cst_13 [1] : vector<8x8xf32> to vector<8xf32>
    %70 = vector.shape_cast %69 : vector<8xf32> to vector<8x1xf32>
    %71 = tpu.reciprocal %70 : vector<8x1xf32> -> vector<8x1xf32>
    %72 = vector.broadcast %71 : vector<8x1xf32> to vector<8x8xf32>
    %73 = arith.mulf %68, %72 : vector<8x8xf32>
    %74 = vector.extract_strided_slice %73 {offsets = [0, 0], sizes = [8, 1], strides = [1, 1]} : vector<8x8xf32> to vector<8x1xf32>
    %75 = vector.extract_strided_slice %62 {offsets = [0, 0], sizes = [8, 128], strides = [1, 1]} : vector<8x1024xf32> to vector<8x128xf32>
    %76 = vector.broadcast %74 : vector<8x1xf32> to vector<8x128xf32>
    %77 = arith.mulf %76, %75 : vector<8x128xf32>
    %78 = arith.addf %58, %77 : vector<8x128xf32>
    %79 = vector.extract_strided_slice %73 {offsets = [0, 1], sizes = [8, 1], strides = [1, 1]} : vector<8x8xf32> to vector<8x1xf32>
    %80 = vector.extract_strided_slice %62 {offsets = [0, 128], sizes = [8, 128], strides = [1, 1]} : vector<8x1024xf32> to vector<8x128xf32>
    %81 = vector.broadcast %79 : vector<8x1xf32> to vector<8x128xf32>
    %82 = arith.mulf %81, %80 : vector<8x128xf32>
    %83 = arith.addf %78, %82 : vector<8x128xf32>
    %84 = vector.extract_strided_slice %73 {offsets = [0, 2], sizes = [8, 1], strides = [1, 1]} : vector<8x8xf32> to vector<8x1xf32>
    %85 = vector.extract_strided_slice %62 {offsets = [0, 256], sizes = [8, 128], strides = [1, 1]} : vector<8x1024xf32> to vector<8x128xf32>
    %86 = vector.broadcast %84 : vector<8x1xf32> to vector<8x128xf32>
    %87 = arith.mulf %86, %85 : vector<8x128xf32>
    %88 = arith.addf %83, %87 : vector<8x128xf32>
    %89 = vector.extract_strided_slice %73 {offsets = [0, 3], sizes = [8, 1], strides = [1, 1]} : vector<8x8xf32> to vector<8x1xf32>
    %90 = vector.extract_strided_slice %62 {offsets = [0, 384], sizes = [8, 128], strides = [1, 1]} : vector<8x1024xf32> to vector<8x128xf32>
    %91 = vector.broadcast %89 : vector<8x1xf32> to vector<8x128xf32>
    %92 = arith.mulf %91, %90 : vector<8x128xf32>
    %93 = arith.addf %88, %92 : vector<8x128xf32>
    %94 = vector.extract_strided_slice %73 {offsets = [0, 4], sizes = [8, 1], strides = [1, 1]} : vector<8x8xf32> to vector<8x1xf32>
    %95 = vector.extract_strided_slice %62 {offsets = [0, 512], sizes = [8, 128], strides = [1, 1]} : vector<8x1024xf32> to vector<8x128xf32>
    %96 = vector.broadcast %94 : vector<8x1xf32> to vector<8x128xf32>
    %97 = arith.mulf %96, %95 : vector<8x128xf32>
    %98 = arith.addf %93, %97 : vector<8x128xf32>
    %99 = vector.extract_strided_slice %73 {offsets = [0, 5], sizes = [8, 1], strides = [1, 1]} : vector<8x8xf32> to vector<8x1xf32>
    %100 = vector.extract_strided_slice %62 {offsets = [0, 640], sizes = [8, 128], strides = [1, 1]} : vector<8x1024xf32> to vector<8x128xf32>
    %101 = vector.broadcast %99 : vector<8x1xf32> to vector<8x128xf32>
    %102 = arith.mulf %101, %100 : vector<8x128xf32>
    %103 = arith.addf %98, %102 : vector<8x128xf32>
    %104 = vector.extract_strided_slice %73 {offsets = [0, 6], sizes = [8, 1], strides = [1, 1]} : vector<8x8xf32> to vector<8x1xf32>
    %105 = vector.extract_strided_slice %62 {offsets = [0, 768], sizes = [8, 128], strides = [1, 1]} : vector<8x1024xf32> to vector<8x128xf32>
    %106 = vector.broadcast %104 : vector<8x1xf32> to vector<8x128xf32>
    %107 = arith.mulf %106, %105 : vector<8x128xf32>
    %108 = arith.addf %103, %107 : vector<8x128xf32>
    %109 = vector.extract_strided_slice %73 {offsets = [0, 7], sizes = [8, 1], strides = [1, 1]} : vector<8x8xf32> to vector<8x1xf32>
    %110 = vector.extract_strided_slice %62 {offsets = [0, 896], sizes = [8, 128], strides = [1, 1]} : vector<8x1024xf32> to vector<8x128xf32>
    %111 = vector.broadcast %109 : vector<8x1xf32> to vector<8x128xf32>
    %112 = arith.mulf %111, %110 : vector<8x128xf32>
    %113 = arith.addf %108, %112 : vector<8x128xf32>
    %cst_14 = arith.constant dense<0.000000e+00> : vector<8x1024xf32>
    %114 = tpu.matmul %113, %1, %cst_14 {dimension_numbers = #tpu.dot_dimension_numbers<[1], [0], [0], [1], [0, 0, 1, 1], [], []>} : vector<8x128xf32>, vector<128x1024xf32>, vector<8x1024xf32> -> vector<8x1024xf32>
    %115 = vector.broadcast %2 : vector<1x1024xf32> to vector<8x1024xf32>
    %116 = arith.addf %114, %115 : vector<8x1024xf32>
    %117 = math.tanh %116 : vector<8x1024xf32>
    %cst_15 = arith.constant dense<0.000000e+00> : vector<8x8xf32>
    %118 = tpu.matmul %117, %3, %cst_15 {dimension_numbers = #tpu.dot_dimension_numbers<[1], [0], [0], [1], [0, 0, 1, 1], [], []>} : vector<8x1024xf32>, vector<1024x8xf32>, vector<8x8xf32> -> vector<8x8xf32>
    %cst_16 = arith.constant dense<0xFF800000> : vector<8xf32>
    %119 = vector.multi_reduction <maximumf>, %118, %cst_16 [1] : vector<8x8xf32> to vector<8xf32>
    %120 = vector.shape_cast %119 : vector<8xf32> to vector<8x1xf32>
    %121 = vector.broadcast %120 : vector<8x1xf32> to vector<8x8xf32>
    %122 = arith.subf %118, %121 : vector<8x8xf32>
    %123 = math.exp %122 : vector<8x8xf32>
    %cst_17 = arith.constant dense<0.000000e+00> : vector<8xf32>
    %124 = vector.multi_reduction <add>, %123, %cst_17 [1] : vector<8x8xf32> to vector<8xf32>
    %125 = vector.shape_cast %124 : vector<8xf32> to vector<8x1xf32>
    %126 = tpu.reciprocal %125 : vector<8x1xf32> -> vector<8x1xf32>
    %127 = vector.broadcast %126 : vector<8x1xf32> to vector<8x8xf32>
    %128 = arith.mulf %123, %127 : vector<8x8xf32>
    %129 = vector.extract_strided_slice %128 {offsets = [0, 0], sizes = [8, 1], strides = [1, 1]} : vector<8x8xf32> to vector<8x1xf32>
    %130 = vector.extract_strided_slice %117 {offsets = [0, 0], sizes = [8, 128], strides = [1, 1]} : vector<8x1024xf32> to vector<8x128xf32>
    %131 = vector.broadcast %129 : vector<8x1xf32> to vector<8x128xf32>
    %132 = arith.mulf %131, %130 : vector<8x128xf32>
    %133 = arith.addf %113, %132 : vector<8x128xf32>
    %134 = vector.extract_strided_slice %128 {offsets = [0, 1], sizes = [8, 1], strides = [1, 1]} : vector<8x8xf32> to vector<8x1xf32>
    %135 = vector.extract_strided_slice %117 {offsets = [0, 128], sizes = [8, 128], strides = [1, 1]} : vector<8x1024xf32> to vector<8x128xf32>
    %136 = vector.broadcast %134 : vector<8x1xf32> to vector<8x128xf32>
    %137 = arith.mulf %136, %135 : vector<8x128xf32>
    %138 = arith.addf %133, %137 : vector<8x128xf32>
    %139 = vector.extract_strided_slice %128 {offsets = [0, 2], sizes = [8, 1], strides = [1, 1]} : vector<8x8xf32> to vector<8x1xf32>
    %140 = vector.extract_strided_slice %117 {offsets = [0, 256], sizes = [8, 128], strides = [1, 1]} : vector<8x1024xf32> to vector<8x128xf32>
    %141 = vector.broadcast %139 : vector<8x1xf32> to vector<8x128xf32>
    %142 = arith.mulf %141, %140 : vector<8x128xf32>
    %143 = arith.addf %138, %142 : vector<8x128xf32>
    %144 = vector.extract_strided_slice %128 {offsets = [0, 3], sizes = [8, 1], strides = [1, 1]} : vector<8x8xf32> to vector<8x1xf32>
    %145 = vector.extract_strided_slice %117 {offsets = [0, 384], sizes = [8, 128], strides = [1, 1]} : vector<8x1024xf32> to vector<8x128xf32>
    %146 = vector.broadcast %144 : vector<8x1xf32> to vector<8x128xf32>
    %147 = arith.mulf %146, %145 : vector<8x128xf32>
    %148 = arith.addf %143, %147 : vector<8x128xf32>
    %149 = vector.extract_strided_slice %128 {offsets = [0, 4], sizes = [8, 1], strides = [1, 1]} : vector<8x8xf32> to vector<8x1xf32>
    %150 = vector.extract_strided_slice %117 {offsets = [0, 512], sizes = [8, 128], strides = [1, 1]} : vector<8x1024xf32> to vector<8x128xf32>
    %151 = vector.broadcast %149 : vector<8x1xf32> to vector<8x128xf32>
    %152 = arith.mulf %151, %150 : vector<8x128xf32>
    %153 = arith.addf %148, %152 : vector<8x128xf32>
    %154 = vector.extract_strided_slice %128 {offsets = [0, 5], sizes = [8, 1], strides = [1, 1]} : vector<8x8xf32> to vector<8x1xf32>
    %155 = vector.extract_strided_slice %117 {offsets = [0, 640], sizes = [8, 128], strides = [1, 1]} : vector<8x1024xf32> to vector<8x128xf32>
    %156 = vector.broadcast %154 : vector<8x1xf32> to vector<8x128xf32>
    %157 = arith.mulf %156, %155 : vector<8x128xf32>
    %158 = arith.addf %153, %157 : vector<8x128xf32>
    %159 = vector.extract_strided_slice %128 {offsets = [0, 6], sizes = [8, 1], strides = [1, 1]} : vector<8x8xf32> to vector<8x1xf32>
    %160 = vector.extract_strided_slice %117 {offsets = [0, 768], sizes = [8, 128], strides = [1, 1]} : vector<8x1024xf32> to vector<8x128xf32>
    %161 = vector.broadcast %159 : vector<8x1xf32> to vector<8x128xf32>
    %162 = arith.mulf %161, %160 : vector<8x128xf32>
    %163 = arith.addf %158, %162 : vector<8x128xf32>
    %164 = vector.extract_strided_slice %128 {offsets = [0, 7], sizes = [8, 1], strides = [1, 1]} : vector<8x8xf32> to vector<8x1xf32>
    %165 = vector.extract_strided_slice %117 {offsets = [0, 896], sizes = [8, 128], strides = [1, 1]} : vector<8x1024xf32> to vector<8x128xf32>
    %166 = vector.broadcast %164 : vector<8x1xf32> to vector<8x128xf32>
    %167 = arith.mulf %166, %165 : vector<8x128xf32>
    %168 = arith.addf %163, %167 : vector<8x128xf32>
    %c0_18 = arith.constant 0 : index
    %c0_19 = arith.constant 0 : index
    %169 = vector.load %arg4[%c0_18, %c0_19] : memref<8x128xf32, #tpu.memory_space<vmem>>, vector<8x128xf32>
    tpu.vector_store %arg4[%c0_18, %c0_19], %168 {strides = array<i32>} : memref<8x128xf32, #tpu.memory_space<vmem>>, vector<8x128xf32>,
    return
  }
}

</mosaic_0001>

<bundles_post_ra>
// kernel: tpu_custom_call.1
= control target key start
LH: loop header
LB: loop body
LE: loop exit
PB: predicated region body
PF: predicated region fallthrough
CT: control target
= control target key end

     0   :  { %v5223_v7 = vmov 0.0   ;;  %s5218_s0 = inlined_call_operand.vmem [shape: f32[8,128], index: 0, kind: input, shape index: {}]   ;;  %s5219_s1 = inlined_call_operand.vmem [shape: f32[128,1024], index: 1, kind: input, shape index: {}]   ;;  %s5220_s2 = inlined_call_operand.vmem [shape: f32[1,1024], index: 2, kind: input, shape index: {}]   ;;  %s5221_s3 = inlined_call_operand.vmem [shape: f32[1024,8], index: 3, kind: input, shape index: {}]   ;;  %s5222_s4 = inlined_call_operand.hbm [shape: f32[8,128], index: 4, kind: output, shape index: {}]  }
   0x1   :  { %v20_v0 = vld [vmem:[%s5219_s1 + $0x8] sm:$0xff]  ;;  %v22_v2 = vld [vmem:[%s5219_s1 + $0x18] sm:$0xff]  ;;  %v19_v5 = vld [vmem:[%s5219_s1] sm:$0xff]  ;;  %381 = vmatprep.mubr.f32.mxu0 %v5223_v7  ;;  %452 = vmatprep.mubr.f32.mxu1 %v5223_v7 }
   0x2   :  { %v28_v1 = vld [vmem:[%s5219_s1 + $0x48] sm:$0xff]  ;;  %v30_v4 = vld [vmem:[%s5219_s1 + $0x58] sm:$0xff]  ;;  %v27_v6 = vld [vmem:[%s5219_s1 + $0x40] sm:$0xff] }
   0x3   :  { %v3580_v3 = vpack.c.bf16 %v28_v1, %v20_v0  ;;  %v3593_v8 = vpack.c.bf16 %v30_v4, %v22_v2  ;;  %v3595_v9 = vpack.c.bf16 %v27_v6, %v19_v5  ;;  %v21_v10 = vld [vmem:[%s5219_s1 + $0x10] sm:$0xff]  ;;  %v36_v12 = vld [vmem:[%s5219_s1 + $0x88] sm:$0xff]  ;;  %v38_v15 = vld [vmem:[%s5219_s1 + $0x98] sm:$0xff] }
   0x4   :  { %v29_v11 = vld [vmem:[%s5219_s1 + $0x50] sm:$0xff]  ;;  %v44_v14 = vld [vmem:[%s5219_s1 + $0xc8] sm:$0xff]  ;;  %v46_v16 = vld [vmem:[%s5219_s1 + $0xd8] sm:$0xff] }
   0x5   :  { %2650 = vmatprep.subr.bf16.mxu0 %v3580_v3  ;;  %v3607_v13 = vpack.c.bf16 %v29_v11, %v21_v10  ;;  %2682 = vmatprep.subr.bf16.mxu1 %v3593_v8  ;;  %v3620_v17 = vpack.c.bf16 %v44_v14, %v36_v12  ;;  %v3622_v18 = vpack.c.bf16 %v46_v16, %v38_v15  ;;  %v35_v19 = vld [vmem:[%s5219_s1 + $0x80] sm:$0xff]  ;;  %v37_v21 = vld [vmem:[%s5219_s1 + $0x90] sm:$0xff]  ;;  %v52_v24 = vld [vmem:[%s5219_s1 + $0x108] sm:$0xff] }
   0x6   :  { %2652 = vmatpush1.bf16.msra.mxu0 %v3595_v9  ;;  %v43_v20 = vld [vmem:[%s5219_s1 + $0xc0] sm:$0xff]  ;;  %v45_v23 = vld [vmem:[%s5219_s1 + $0xd0] sm:$0xff]  ;;  %v60_v25 = vld [vmem:[%s5219_s1 + $0x148] sm:$0xff] }
   0x7   :  { %2684 = vmatpush1.bf16.msra.mxu1 %v3607_v13  ;;  %v3634_v22 = vpack.c.bf16 %v43_v20, %v35_v19  ;;  %2654 = vmatprep.subr.bf16.mxu0 %v3620_v17  ;;  %v3647_v26 = vpack.c.bf16 %v45_v23, %v37_v21  ;;  %v3649_v27 = vpack.c.bf16 %v60_v25, %v52_v24  ;;  %v54_v28 = vld [vmem:[%s5219_s1 + $0x118] sm:$0xff]  ;;  %v51_v30 = vld [vmem:[%s5219_s1 + $0x100] sm:$0xff]  ;;  %v53_v33 = vld [vmem:[%s5219_s1 + $0x110] sm:$0xff] }
   0x8   :  { %2686 = vmatprep.subr.bf16.mxu1 %v3622_v18  ;;  %v62_v29 = vld [vmem:[%s5219_s1 + $0x158] sm:$0xff]  ;;  %v59_v32 = vld [vmem:[%s5219_s1 + $0x140] sm:$0xff]  ;;  %v61_v34 = vld [vmem:[%s5219_s1 + $0x150] sm:$0xff] }
   0x9   :  { %v3660_v31 = vpack.c.bf16 %v62_v29, %v54_v28  ;;  %v3672_v35 = vpack.c.bf16 %v59_v32, %v51_v30  ;;  %v68_v36 = vld [vmem:[%s5219_s1 + $0x188] sm:$0xff]  ;;  %v70_v38 = vld [vmem:[%s5219_s1 + $0x198] sm:$0xff]  ;;  %v3685_v39 = vpack.c.bf16 %v61_v34, %v53_v33  ;;  %v67_v42 = vld [vmem:[%s5219_s1 + $0x180] sm:$0xff] }
   0xa   :  { %2656 = vmatpush1.bf16.msra.mxu0 %v3634_v22  ;;  %v76_v37 = vld [vmem:[%s5219_s1 + $0x1c8] sm:$0xff]  ;;  %v78_v41 = vld [vmem:[%s5219_s1 + $0x1d8] sm:$0xff]  ;;  %v75_v43 = vld [vmem:[%s5219_s1 + $0x1c0] sm:$0xff] }
   0xb   :  { %2688 = vmatpush1.bf16.msra.mxu1 %v3647_v26  ;;  %2658 = vmatprep.subr.bf16.mxu0 %v3649_v27  ;;  %v3687_v40 = vpack.c.bf16 %v76_v37, %v68_v36  ;;  %v3699_v44 = vpack.c.bf16 %v78_v41, %v70_v38  ;;  %v69_v45 = vld [vmem:[%s5219_s1 + $0x190] sm:$0xff]  ;;  %v84_v47 = vld [vmem:[%s5219_s1 + $0x208] sm:$0xff]  ;;  %v86_v49 = vld [vmem:[%s5219_s1 + $0x218] sm:$0xff]  ;;  %v3720_v51 = vpack.c.bf16 %v75_v43, %v67_v42 }
   0xc   :  { %2690 = vmatprep.subr.bf16.mxu1 %v3660_v31  ;;  %v77_v46 = vld [vmem:[%s5219_s1 + $0x1d0] sm:$0xff]  ;;  %v92_v48 = vld [vmem:[%s5219_s1 + $0x248] sm:$0xff]  ;;  %v94_v50 = vld [vmem:[%s5219_s1 + $0x258] sm:$0xff] }
   0xd   :  { %v3724_v52 = vpack.c.bf16 %v77_v46, %v69_v45  ;;  %v3726_v53 = vpack.c.bf16 %v92_v48, %v84_v47  ;;  %v83_v54 = vld [vmem:[%s5219_s1 + $0x200] sm:$0xff]  ;;  %v85_v56 = vld [vmem:[%s5219_s1 + $0x210] sm:$0xff]  ;;  %v3738_v57 = vpack.c.bf16 %v94_v50, %v86_v49  ;;  %v100_v59 = vld [vmem:[%s5219_s1 + $0x288] sm:$0xff] }
   0xe   :  { %2660 = vmatpush1.bf16.msra.mxu0 %v3672_v35  ;;  %v91_v55 = vld [vmem:[%s5219_s1 + $0x240] sm:$0xff]  ;;  %v93_v58 = vld [vmem:[%s5219_s1 + $0x250] sm:$0xff]  ;;  %v108_v60 = vld [vmem:[%s5219_s1 + $0x2c8] sm:$0xff] }
   0xf   :  { %2692 = vmatpush1.bf16.msra.mxu1 %v3685_v39  ;;  %2662 = vmatprep.subr.bf16.mxu0 %v3687_v40  ;;  %v102_v61 = vld [vmem:[%s5219_s1 + $0x298] sm:$0xff]  ;;  %v3756_v63 = vpack.c.bf16 %v91_v55, %v83_v54  ;;  %v3760_v0 = vpack.c.bf16 %v93_v58, %v85_v56  ;;  %v3762_v1 = vpack.c.bf16 %v108_v60, %v100_v59  ;;  %v99_v2 = vld [vmem:[%s5219_s1 + $0x280] sm:$0xff]  ;;  %v101_v5 = vld [vmem:[%s5219_s1 + $0x290] sm:$0xff] }
  0x10   :  { %2694 = vmatprep.subr.bf16.mxu1 %v3699_v44  ;;  %v110_v62 = vld [vmem:[%s5219_s1 + $0x2d8] sm:$0xff]  ;;  %v107_v4 = vld [vmem:[%s5219_s1 + $0x2c0] sm:$0xff]  ;;  %v109_v10 = vld [vmem:[%s5219_s1 + $0x2d0] sm:$0xff] }
  0x11   :  { %5423 = vst [vmem:[#allocation5_spill] sm:$0xff] %v3756_v63  ;;  %5424 = vst [vmem:[#allocation6_spill] sm:$0xff] %v3760_v0  ;;  %v3774_v6 = vpack.c.bf16 %v110_v62, %v102_v61  ;;  %v116_v11 = vld [vmem:[%s5219_s1 + $0x308] sm:$0xff]  ;;  %v118_v14 = vld [vmem:[%s5219_s1 + $0x318] sm:$0xff]  ;;  %v3792_v16 = vpack.c.bf16 %v107_v4, %v99_v2  ;;  %v3796_v19 = vpack.c.bf16 %v109_v10, %v101_v5 }
  0x12   :  { %2664 = vmatpush1.bf16.msra.mxu0 %v3720_v51  ;;  %5425 = vst [vmem:[#allocation7_spill] sm:$0xff] %v3762_v1  ;;  %v124_v12 = vld [vmem:[%s5219_s1 + $0x348] sm:$0xff]  ;;  %v126_v15 = vld [vmem:[%s5219_s1 + $0x358] sm:$0xff]  ;;  %v115_v21 = vld [vmem:[%s5219_s1 + $0x300] sm:$0xff] }
  0x13   :  { %2696 = vmatpush1.bf16.msra.mxu1 %v3724_v52  ;;  %2666 = vmatprep.subr.bf16.mxu0 %v3726_v53  ;;  %5426 = vst [vmem:[#allocation8_spill] sm:$0xff] %v3774_v6  ;;  %5427 = vst [vmem:[#allocation9_spill] sm:$0xff] %v3792_v16  ;;  %v3798_v20 = vpack.c.bf16 %v124_v12, %v116_v11  ;;  %v123_v23 = vld [vmem:[%s5219_s1 + $0x340] sm:$0xff]  ;;  %v117_v24 = vld [vmem:[%s5219_s1 + $0x310] sm:$0xff]  ;;  %v3810_v25 = vpack.c.bf16 %v126_v15, %v118_v14 }
  0x14   :  { %2698 = vmatprep.subr.bf16.mxu1 %v3738_v57  ;;  %5428 = vst [vmem:[#allocation10_spill] sm:$0xff] %v3796_v19  ;;  %v125_v28 = vld [vmem:[%s5219_s1 + $0x350] sm:$0xff]  ;;  %v132_v29 = vld [vmem:[%s5219_s1 + $0x388] sm:$0xff]  ;;  %v134_v32 = vld [vmem:[%s5219_s1 + $0x398] sm:$0xff]  ;;  %v3828_v34 = vpack.c.bf16 %v123_v23, %v115_v21 }
  0x15   :  { %5429 = vst [vmem:[#allocation11_spill] sm:$0xff] %v3798_v20  ;;  %5430 = vst [vmem:[#allocation12_spill] sm:$0xff] %v3810_v25  ;;  %v140_v30 = vld [vmem:[%s5219_s1 + $0x3c8] sm:$0xff]  ;;  %v142_v33 = vld [vmem:[%s5219_s1 + $0x3d8] sm:$0xff]  ;;  %v3832_v36 = vpack.c.bf16 %v125_v28, %v117_v24 }
  0x16   :  { %2668 = vmatpush1.bf16.msra.mxu0 %v3756_v63  ;;  %5431 = vst [vmem:[#allocation13_spill] sm:$0xff] %v3828_v34  ;;  %v3834_v37 = vpack.c.bf16 %v140_v30, %v132_v29  ;;  %v131_v38 = vld [vmem:[%s5219_s1 + $0x380] sm:$0xff]  ;;  %v133_v42 = vld [vmem:[%s5219_s1 + $0x390] sm:$0xff]  ;;  %v3846_v43 = vpack.c.bf16 %v142_v33, %v134_v32  ;;  %v24_v46 = vld [vmem:[%s5219_s1 + $0x28] sm:$0xff] }
  0x17   :  { %2700 = vmatpush1.bf16.msra.mxu1 %v3760_v0  ;;  %2670 = vmatprep.subr.bf16.mxu0 %v3762_v1  ;;  %5432 = vst [vmem:[#allocation14_spill] sm:$0xff] %v3832_v36  ;;  %v139_v41 = vld [vmem:[%s5219_s1 + $0x3c0] sm:$0xff]  ;;  %v141_v45 = vld [vmem:[%s5219_s1 + $0x3d0] sm:$0xff]  ;;  %v32_v47 = vld [vmem:[%s5219_s1 + $0x68] sm:$0xff] }
  0x18   :  { %2702 = vmatprep.subr.bf16.mxu1 %v3774_v6  ;;  %5433 = vst [vmem:[#allocation15_spill] sm:$0xff] %v3834_v37  ;;  %5434 = vst [vmem:[#allocation16_spill] sm:$0xff] %v3846_v43  ;;  %v26_v48 = vld [vmem:[%s5219_s1 + $0x38] sm:$0xff]  ;;  %v3864_v50 = vpack.c.bf16 %v139_v41, %v131_v38  ;;  %v3868_v54 = vpack.c.bf16 %v141_v45, %v133_v42  ;;  %v3870_v55 = vpack.c.bf16 %v32_v47, %v24_v46  ;;  %v23_v56 = vld [vmem:[%s5219_s1 + $0x20] sm:$0xff] }
  0x19   :  { %v34_v49 = vld [vmem:[%s5219_s1 + $0x78] sm:$0xff]  ;;  %v31_v58 = vld [vmem:[%s5219_s1 + $0x60] sm:$0xff]  ;;  %v25_v59 = vld [vmem:[%s5219_s1 + $0x30] sm:$0xff] }
  0x1a   :  { %2672 = vmatpush1.bf16.msra.mxu0 %v3792_v16  ;;  %5435 = vst [vmem:[#allocation17_spill] sm:$0xff] %v3864_v50  ;;  %5436 = vst [vmem:[#allocation18_spill] sm:$0xff] %v3868_v54  ;;  %v3882_v60 = vpack.c.bf16 %v34_v49, %v26_v48  ;;  %v33_v61 = vld [vmem:[%s5219_s1 + $0x70] sm:$0xff]  ;;  %v40_v62 = vld [vmem:[%s5219_s1 + $0xa8] sm:$0xff]  ;;  %v3905_v11 = vpack.c.bf16 %v31_v58, %v23_v56 }
  0x1b   :  { %2704 = vmatpush1.bf16.msra.mxu1 %v3796_v19  ;;  %2674 = vmatprep.subr.bf16.mxu0 %v3798_v20  ;;  %5437 = vst [vmem:[#allocation19_spill] sm:$0xff] %v3870_v55  ;;  %v48_v2 = vld [vmem:[%s5219_s1 + $0xe8] sm:$0xff]  ;;  %v42_v4 = vld [vmem:[%s5219_s1 + $0xb8] sm:$0xff]  ;;  %v3903_v10 = vld [vmem:[%s5218_s0] sm:$0xff]  ;;  %v3909_v12 = vpack.c.bf16 %v33_v61, %v25_v59 }
  0x1c   :  { %2706 = vmatprep.subr.bf16.mxu1 %v3810_v25  ;;  %5438 = vst [vmem:[#allocation20_spill] sm:$0xff] %v3882_v60  ;;  %v50_v5 = vld [vmem:[%s5219_s1 + $0xf8] sm:$0xff]  ;;  %v3911_v14 = vpack.c.bf16 %v48_v2, %v40_v62  ;;  %v39_v15 = vld [vmem:[%s5219_s1 + $0xa0] sm:$0xff]  ;;  %v41_v23 = vld [vmem:[%s5219_s1 + $0xb0] sm:$0xff] }
  0x1d   :  { %5439 = vst [vmem:[#allocation21_spill] sm:$0xff] %v3909_v12  ;;  %v47_v21 = vld [vmem:[%s5219_s1 + $0xe0] sm:$0xff]  ;;  %v3923_v24 = vpack.c.bf16 %v50_v5, %v42_v4  ;;  %v49_v28 = vld [vmem:[%s5219_s1 + $0xf0] sm:$0xff]  ;;  %v56_v29 = vld [vmem:[%s5219_s1 + $0x128] sm:$0xff] }
  0x1e   :  { %2676 = vmatpush1.bf16.msra.mxu0 %v3828_v34  ;;  %5440 = vst [vmem:[#allocation22_spill] sm:$0xff] %v3911_v14  ;;  %v64_v30 = vld [vmem:[%s5219_s1 + $0x168] sm:$0xff]  ;;  %v58_v32 = vld [vmem:[%s5219_s1 + $0x138] sm:$0xff]  ;;  %v3943_v38 = vpack.c.bf16 %v47_v21, %v39_v15  ;;  %v3947_v41 = vpack.c.bf16 %v49_v28, %v41_v23  ;;  %v55_v45 = vld [vmem:[%s5219_s1 + $0x120] sm:$0xff] }
  0x1f   :  { %2708 = vmatpush1.bf16.msra.mxu1 %v3832_v36  ;;  %2678 = vmatprep.subr.bf16.mxu0 %v3834_v37  ;;  %5441 = vst [vmem:[#allocation23_spill] sm:$0xff] %v3923_v24  ;;  %v66_v33 = vld [vmem:[%s5219_s1 + $0x178] sm:$0xff]  ;;  %v3949_v42 = vpack.c.bf16 %v64_v30, %v56_v29  ;;  %v63_v46 = vld [vmem:[%s5219_s1 + $0x160] sm:$0xff]  ;;  %v57_v47 = vld [vmem:[%s5219_s1 + $0x130] sm:$0xff] }
  0x20   :  { %2710 = vmatprep.subr.bf16.mxu1 %v3846_v43  ;;  %5442 = vst [vmem:[#allocation24_spill] sm:$0xff] %v3943_v38  ;;  %5443 = vst [vmem:[#allocation25_spill] sm:$0xff] %v3947_v41  ;;  %v3961_v48 = vpack.c.bf16 %v66_v33, %v58_v32  ;;  %v65_v49 = vld [vmem:[%s5219_s1 + $0x170] sm:$0xff]  ;;  %v72_v56 = vld [vmem:[%s5219_s1 + $0x1a8] sm:$0xff]  ;;  %v3981_v62 = vpack.c.bf16 %v63_v46, %v55_v45 }
  0x21   :  { %5444 = vst [vmem:[#allocation26_spill] sm:$0xff] %v3949_v42  ;;  %v80_v58 = vld [vmem:[%s5219_s1 + $0x1e8] sm:$0xff]  ;;  %v74_v59 = vld [vmem:[%s5219_s1 + $0x1b8] sm:$0xff]  ;;  %v3985_v2 = vpack.c.bf16 %v65_v49, %v57_v47  ;;  %v71_v5 = vld [vmem:[%s5219_s1 + $0x1a0] sm:$0xff] }
  0x22   :  { %2680 = vmatpush1.bf16.msra.mxu0 %v3864_v50  ;;  %5445 = vst [vmem:[#allocation27_spill] sm:$0xff] %v3961_v48  ;;  %v82_v61 = vld [vmem:[%s5219_s1 + $0x1f8] sm:$0xff]  ;;  %5446 = vst [vmem:[#allocation28_spill] sm:$0xff] %v3981_v62  ;;  %v3987_v4 = vpack.c.bf16 %v80_v58, %v72_v56  ;;  %v79_v15 = vld [vmem:[%s5219_s1 + $0x1e0] sm:$0xff] }
  0x23   :  { %2712 = vmatpush1.bf16.msra.mxu1 %v3868_v54  ;;  %2714 = vmatprep.subr.bf16.mxu0 %v3870_v55  ;;  %5447 = vst [vmem:[#allocation29_spill] sm:$0xff] %v3985_v2  ;;  %v73_v21 = vld [vmem:[%s5219_s1 + $0x1b0] sm:$0xff]  ;;  %v3999_v23 = vpack.c.bf16 %v82_v61, %v74_v59  ;;  %v88_v29 = vld [vmem:[%s5219_s1 + $0x228] sm:$0xff]  ;;  %v90_v32 = vld [vmem:[%s5219_s1 + $0x238] sm:$0xff]  ;;  %v4017_v45 = vpack.c.bf16 %v79_v15, %v71_v5 }
  0x24   :  { %2746 = vmatprep.subr.bf16.mxu1 %v3882_v60  ;;  %5448 = vst [vmem:[#allocation30_spill] sm:$0xff] %v3987_v4  ;;  %v81_v28 = vld [vmem:[%s5219_s1 + $0x1f0] sm:$0xff]  ;;  %v96_v30 = vld [vmem:[%s5219_s1 + $0x268] sm:$0xff]  ;;  %v98_v33 = vld [vmem:[%s5219_s1 + $0x278] sm:$0xff] }
  0x25   :  { %382 = vmatmul.mubr.f32.vlgmr.msra.gmra.mrb[0].mxu0 %v3903_v10  ;;  %5449 = vst [vmem:[#allocation31_spill] sm:$0xff] %v3999_v23  ;;  %5450 = vst [vmem:[#allocation32_spill] sm:$0xff] %v4017_v45  ;;  %v4021_v46 = vpack.c.bf16 %v81_v28, %v73_v21  ;;  %v4023_v47 = vpack.c.bf16 %v96_v30, %v88_v29  ;;  %v87_v49 = vld [vmem:[%s5219_s1 + $0x220] sm:$0xff]  ;;  %v89_v58 = vld [vmem:[%s5219_s1 + $0x230] sm:$0xff]  ;;  %v4035_v59 = vpack.c.bf16 %v98_v33, %v90_v32 }
  0x26   :  { %453 = vmatmul.mubr.f32.vlgmr.msra.gmra.mrb[0].mxu1 %v3903_v10  ;;  %2716 = vmatpush1.bf16.msra.mxu0 %v3905_v11  ;;  %v95_v56 = vld [vmem:[%s5219_s1 + $0x260] sm:$0xff]  ;;  %v97_v61 = vld [vmem:[%s5219_s1 + $0x270] sm:$0xff]  ;;  %v104_v5 = vld [vmem:[%s5219_s1 + $0x2a8] sm:$0xff] }
  0x27   :  { %2748 = vmatpush1.bf16.msra.mxu1 %v3909_v12  ;;  %2718 = vmatprep.subr.bf16.mxu0 %v3911_v14  ;;  %5451 = vst [vmem:[#allocation33_spill] sm:$0xff] %v4021_v46  ;;  %5452 = vst [vmem:[#allocation34_spill] sm:$0xff] %v4023_v47  ;;  %v112_v15 = vld [vmem:[%s5219_s1 + $0x2e8] sm:$0xff]  ;;  %v106_v21 = vld [vmem:[%s5219_s1 + $0x2b8] sm:$0xff]  ;;  %v4053_v29 = vpack.c.bf16 %v95_v56, %v87_v49  ;;  %v4057_v30 = vpack.c.bf16 %v97_v61, %v89_v58 }
  0x28   :  { %2750 = vmatprep.subr.bf16.mxu1 %v3923_v24  ;;  %523 = vmatprep.mubr.f32.mxu0 %v5223_v7  ;;  %5453 = vst [vmem:[#allocation35_spill] sm:$0xff] %v4035_v59  ;;  %v114_v28 = vld [vmem:[%s5219_s1 + $0x2f8] sm:$0xff]  ;;  %v4059_v32 = vpack.c.bf16 %v112_v15, %v104_v5  ;;  %v103_v33 = vld [vmem:[%s5219_s1 + $0x2a0] sm:$0xff]  ;;  %v105_v49 = vld [vmem:[%s5219_s1 + $0x2b0] sm:$0xff] }
  0x29   :  { %594 = vmatprep.mubr.f32.mxu1 %v5223_v7  ;;  %5454 = vst [vmem:[#allocation36_spill] sm:$0xff] %v4053_v29  ;;  %5455 = vst [vmem:[#allocation37_spill] sm:$0xff] %v4057_v30  ;;  %v111_v7 = vld [vmem:[%s5219_s1 + $0x2e0] sm:$0xff]  ;;  %v4071_v56 = vpack.c.bf16 %v114_v28, %v106_v21  ;;  %v113_v58 = vld [vmem:[%s5219_s1 + $0x2f0] sm:$0xff] }
  0x2a   :  { %2720 = vmatpush1.bf16.msra.mxu0 %v3943_v38  ;;  %5456 = vst [vmem:[#allocation38_spill] sm:$0xff] %v4059_v32  ;;  %v120_v61 = vld [vmem:[%s5219_s1 + $0x328] sm:$0xff]  ;;  %v122_v15 = vld [vmem:[%s5219_s1 + $0x338] sm:$0xff]  ;;  %v4089_v28 = vpack.c.bf16 %v111_v7, %v103_v33  ;;  %v121_v7 = vld [vmem:[%s5219_s1 + $0x330] sm:$0xff] }
  0x2b   :  { %2752 = vmatpush1.bf16.msra.mxu1 %v3947_v41  ;;  %2722 = vmatprep.subr.bf16.mxu0 %v3949_v42  ;;  %5457 = vst [vmem:[#allocation39_spill] sm:$0xff] %v4071_v56  ;;  %v128_v5 = vld [vmem:[%s5219_s1 + $0x368] sm:$0xff]  ;;  %v130_v21 = vld [vmem:[%s5219_s1 + $0x378] sm:$0xff]  ;;  %v129_v33 = vld [vmem:[%s5219_s1 + $0x370] sm:$0xff] }
  0x2c   :  { %2754 = vmatprep.subr.bf16.mxu1 %v3961_v48  ;;  %5458 = vst [vmem:[#allocation40_spill] sm:$0xff] %v4089_v28 }
  0x2e   :  { %2724 = vmatpush1.bf16.msra.mxu0 %v3981_v62 }
  0x2f   :  { %2756 = vmatpush1.bf16.msra.mxu1 %v3985_v2  ;;  %2726 = vmatprep.subr.bf16.mxu0 %v3987_v4 }
  0x30   :  { %2758 = vmatprep.subr.bf16.mxu1 %v3999_v23 }
  0x32   :  { %2728 = vmatpush1.bf16.msra.mxu0 %v4017_v45  ;;  %v127_v45 = vld [vmem:[%s5219_s1 + $0x360] sm:$0xff] }
  0x33   :  { %2760 = vmatpush1.bf16.msra.mxu1 %v4021_v46  ;;  %2730 = vmatprep.subr.bf16.mxu0 %v4023_v47  ;;  %v4096_v47 = vpack.c.bf16 %v113_v58, %v105_v49  ;;  %v4098_v46 = vpack.c.bf16 %v128_v5, %v120_v61  ;;  %v136_v49 = vld [vmem:[%s5219_s1 + $0x3a8] sm:$0xff] }
  0x34   :  { %2762 = vmatprep.subr.bf16.mxu1 %v4035_v59  ;;  %v119_v59 = vld [vmem:[%s5219_s1 + $0x320] sm:$0xff]  ;;  %v144_v58 = vld [vmem:[%s5219_s1 + $0x3e8] sm:$0xff] }
  0x35   :  { %5459 = vst [vmem:[#allocation41_spill] sm:$0xff] %v4096_v47  ;;  %5460 = vst [vmem:[#allocation42_spill] sm:$0xff] %v4098_v46 }
  0x36   :  { %2732 = vmatpush1.bf16.msra.mxu0 %v4053_v29 }
  0x37   :  { %2764 = vmatpush1.bf16.msra.mxu1 %v4057_v30  ;;  %2734 = vmatprep.subr.bf16.mxu0 %v4059_v32  ;;  %v4110_v30 = vpack.c.bf16 %v130_v21, %v122_v15 }
  0x38   :  { %2766 = vmatprep.subr.bf16.mxu1 %v4071_v56 }
  0x39   :  { %5461 = vst [vmem:[#allocation43_spill] sm:$0xff] %v4110_v30 }
  0x3a   :  { %9 = vsyncpa [#allocation3], 0  ;;  %v138_v61 = vld [vmem:[%s5219_s1 + $0x3b8] sm:$0xff]  ;;  %2736 = vmatpush1.bf16.msra.mxu0 %v4089_v28  ;;  %v4125_v15 = vpack.c.bf16 %v127_v45, %v119_v59  ;;  %v4129_v21 = vpack.c.bf16 %v129_v33, %v121_v7  ;;  %v4131_v56 = vpack.c.bf16 %v144_v58, %v136_v49  ;;  %v135_v32 = vld [vmem:[%s5219_s1 + $0x3a0] sm:$0xff]  ;;  %vm889_vm0 = vcmask 64512  }
  0x3b   :  { %v146_v5 = vld [vmem:[%s5219_s1 + $0x3f8] sm:$0xff]  ;;  %2768 = vmatpush1.bf16.msra.mxu1 %v4096_v47  ;;  %2738 = vmatprep.subr.bf16.mxu0 %v4098_v46  ;;  %v143_v29 = vld [vmem:[%s5219_s1 + $0x3e0] sm:$0xff]  ;;  %v137_v45 = vld [vmem:[%s5219_s1 + $0x3b0] sm:$0xff] }
  0x3c   :  { %5462 = vst [vmem:[#allocation44_spill] sm:$0xff] %v4125_v15  ;;  %5463 = vst [vmem:[#allocation45_spill] sm:$0xff] %v4129_v21  ;;  %2770 = vmatprep.subr.bf16.mxu1 %v4110_v30  ;;  %v4143_v59 = vpack.c.bf16 %v146_v5, %v138_v61  ;;  %v145_v7 = vld [vmem:[%s5219_s1 + $0x3f0] sm:$0xff]  ;;  %v164_v33 = vld [vmem:[%s5221_s3 + $0x80] sm:$0xff]  ;;  %v4161_v5 = vpack.c.bf16 %v143_v29, %v135_v32 }
  0x3d   :  { %5464 = vst [vmem:[#allocation46_spill] sm:$0xff] %v4131_v56  ;;  %v165_v49 = vld [vmem:[%s5221_s3 + $0x88] sm:$0xff]  ;;  %v196_v58 = vld [vmem:[%s5221_s3 + $0x180] sm:$0xff]  ;;  %v4165_v30 = vpack.c.bf16 %v145_v7, %v137_v45  ;;  %v166_v7 = vld [vmem:[%s5221_s3 + $0x90] sm:$0xff] }
  0x3e   :  { %5465 = vst [vmem:[#allocation47_spill] sm:$0xff] %v4143_v59  ;;  %v197_v61 = vld [vmem:[%s5221_s3 + $0x188] sm:$0xff]  ;;  %2740 = vmatpush1.bf16.msra.mxu0 %v4125_v15  ;;  %5466 = vst [vmem:[#allocation48_spill] sm:$0xff] %v4161_v5  ;;  %v4167_v46 = vpack.c.bf16 %v165_v49, %v164_v33  ;;  %v148_v47 = vld [vmem:[%s5221_s3] sm:$0xff] }
  0x3f   :  { %2772 = vmatpush1.bf16.msra.mxu1 %v4129_v21  ;;  %2742 = vmatprep.subr.bf16.mxu0 %v4131_v56  ;;  %5467 = vst [vmem:[#allocation49_spill] sm:$0xff] %v4165_v30  ;;  %v149_v28 = vld [vmem:[%s5221_s3 + $0x8] sm:$0xff]  ;;  %v180_v29 = vld [vmem:[%s5221_s3 + $0x100] sm:$0xff]  ;;  %v4179_v32 = vpack.c.bf16 %v197_v61, %v196_v58  ;;  %v167_v33 = vld [vmem:[%s5221_s3 + $0x98] sm:$0xff] }
  0x40   :  { %5468 = vst [vmem:[#allocation50_spill] sm:$0xff] %v4167_v46  ;;  %2774 = vmatprep.subr.bf16.mxu1 %v4143_v59  ;;  %v181_v45 = vld [vmem:[%s5221_s3 + $0x108] sm:$0xff]  ;;  %v198_v49 = vld [vmem:[%s5221_s3 + $0x190] sm:$0xff]  ;;  %v199_v58 = vld [vmem:[%s5221_s3 + $0x198] sm:$0xff]  ;;  %v4197_v61 = vpack.c.bf16 %v149_v28, %v148_v47  ;;  %v4203_v56 = vpack.c.bf16 %v167_v33, %v166_v7 }
  0x41   :  { %5469 = vst [vmem:[#allocation51_spill] sm:$0xff] %v4179_v32  ;;  %v4201_v59 = vpack.c.bf16 %v181_v45, %v180_v29  ;;  %v150_v21 = vld [vmem:[%s5221_s3 + $0x10] sm:$0xff]  ;;  %v151_v15 = vld [vmem:[%s5221_s3 + $0x18] sm:$0xff]  ;;  %v4215_v28 = vpack.c.bf16 %v199_v58, %v198_v49  ;;  %v168_v45 = vld [vmem:[%s5221_s3 + $0xa0] sm:$0xff] }
  0x42   :  { %2744 = vmatpush1.bf16.msra.mxu0 %v4161_v5  ;;  %5470 = vst [vmem:[#allocation52_spill] sm:$0xff] %v4197_v61  ;;  %5472 = vst [vmem:[#allocation54_spill] sm:$0xff] %v4203_v56  ;;  %v182_v47 = vld [vmem:[%s5221_s3 + $0x110] sm:$0xff]  ;;  %v183_v29 = vld [vmem:[%s5221_s3 + $0x118] sm:$0xff]  ;;  %v4235_v58 = vpack.c.bf16 %v151_v15, %v150_v21 }
  0x43   :  { %2776 = vmatpush1.bf16.msra.mxu1 %v4165_v30  ;;  %2778 = vmatprep.subr.bf16.mxu0 %v4167_v46  ;;  %5471 = vst [vmem:[#allocation53_spill] sm:$0xff] %v4201_v59  ;;  %5473 = vst [vmem:[#allocation55_spill] sm:$0xff] %v4215_v28  ;;  %v169_v7 = vld [vmem:[%s5221_s3 + $0xa8] sm:$0xff]  ;;  %v200_v33 = vld [vmem:[%s5221_s3 + $0x1a0] sm:$0xff] }
  0x44   :  { %2810 = vmatprep.subr.bf16.mxu1 %v4179_v32  ;;  %v201_v49 = vld [vmem:[%s5221_s3 + $0x1a8] sm:$0xff]  ;;  %5474 = vst [vmem:[#allocation56_spill] sm:$0xff] %v4235_v58  ;;  %v4239_v32 = vpack.c.bf16 %v183_v29, %v182_v47  ;;  %v4241_v46 = vpack.c.bf16 %v169_v7, %v168_v45  ;;  %v152_v30 = vld [vmem:[%s5221_s3 + $0x20] sm:$0xff]  ;;  %v170_v29 = vld [vmem:[%s5221_s3 + $0xb0] sm:$0xff] }
  0x45   :  { %524 = vmatmul.mubr.f32.vlgmr.msra.gmra.mrb[2].mxu0 %v3903_v10  ;;  %v184_v15 = vld [vmem:[%s5221_s3 + $0x120] sm:$0xff]  ;;  %v4253_v21 = vpack.c.bf16 %v201_v49, %v200_v33  ;;  %v185_v47 = vld [vmem:[%s5221_s3 + $0x128] sm:$0xff]  ;;  %v171_v45 = vld [vmem:[%s5221_s3 + $0xb8] sm:$0xff] }
  0x46   :  { %595 = vmatmul.mubr.f32.vlgmr.msra.gmra.mrb[2].mxu1 %v3903_v10  ;;  %2780 = vmatpush3.bf16.msra.mxu0 %v4197_v61  ;;  %5475 = vst [vmem:[#allocation57_spill] sm:$0xff] %v4239_v32  ;;  %5476 = vst [vmem:[#allocation58_spill] sm:$0xff] %v4241_v46  ;;  %v153_v10 = vld [vmem:[%s5221_s3 + $0x28] sm:$0xff]  ;;  %v202_v7 = vld [vmem:[%s5221_s3 + $0x1b0] sm:$0xff] }
  0x47   :  { %2812 = vmatpush3.bf16.msra.mxu1 %v4201_v59  ;;  %2782 = vmatprep.subr.bf16.mxu0 %v4203_v56  ;;  %5477 = vst [vmem:[#allocation59_spill] sm:$0xff] %v4253_v21  ;;  %v203_v33 = vld [vmem:[%s5221_s3 + $0x1b8] sm:$0xff]  ;;  %v4271_v49 = vpack.c.bf16 %v153_v10, %v152_v30  ;;  %v4277_v56 = vpack.c.bf16 %v171_v45, %v170_v29  ;;  %v154_v59 = vld [vmem:[%s5221_s3 + $0x30] sm:$0xff]  ;;  %v172_v45 = vld [vmem:[%s5221_s3 + $0xc0] sm:$0xff] }
  0x48   :  { %2814 = vmatprep.subr.bf16.mxu1 %v4215_v28  ;;  %v4275_v28 = vpack.c.bf16 %v185_v47, %v184_v15  ;;  %v155_v61 = vld [vmem:[%s5221_s3 + $0x38] sm:$0xff]  ;;  %v4286_v30 = vpack.c.bf16 %v203_v33, %v202_v7  ;;  %v186_v10 = vld [vmem:[%s5221_s3 + $0x130] sm:$0xff]  ;;  %v205_v33 = vld [vmem:[%s5221_s3 + $0x1c8] sm:$0xff] }
  0x49   :  { %5478 = vst [vmem:[#allocation60_spill] sm:$0xff] %v4271_v49  ;;  %5480 = vst [vmem:[#allocation62_spill] sm:$0xff] %v4277_v56  ;;  %v187_v15 = vld [vmem:[%s5221_s3 + $0x138] sm:$0xff]  ;;  %v4295_v47 = vpack.c.bf16 %v155_v61, %v154_v59  ;;  %v173_v59 = vld [vmem:[%s5221_s3 + $0xc8] sm:$0xff] }
  0x4a   :  { %2784 = vmatpush3.bf16.msra.mxu0 %v4235_v58  ;;  %5479 = vst [vmem:[#allocation61_spill] sm:$0xff] %v4275_v28  ;;  %5481 = vst [vmem:[#allocation63_spill] sm:$0xff] %v4286_v30  ;;  %v4299_v29 = vpack.c.bf16 %v187_v15, %v186_v10  ;;  %v204_v61 = vld [vmem:[%s5221_s3 + $0x1c0] sm:$0xff]  ;;  %v4313_v7 = vpack.c.bf16 %v173_v59, %v172_v45  ;;  %v189_v59 = vld [vmem:[%s5221_s3 + $0x148] sm:$0xff] }
  0x4b   :  { %2816 = vmatpush3.bf16.msra.mxu1 %v4239_v32  ;;  %2786 = vmatprep.subr.bf16.mxu0 %v4241_v46  ;;  %5482 = vst [vmem:[#allocation64_spill] sm:$0xff] %v4295_v47  ;;  %v4318_v10 = vpack.c.bf16 %v205_v33, %v204_v61  ;;  %v156_v15 = vld [vmem:[%s5221_s3 + $0x40] sm:$0xff]  ;;  %v174_v33 = vld [vmem:[%s5221_s3 + $0xd0] sm:$0xff]  ;;  %v215_v5 = vld [vmem:[%s5221_s3 + $0x218] sm:$0xff] }
  0x4c   :  { %2818 = vmatprep.subr.bf16.mxu1 %v4253_v21  ;;  %5483 = vst [vmem:[#allocation65_spill] sm:$0xff] %v4299_v29  ;;  %5484 = vst [vmem:[#allocation66_spill] sm:$0xff] %v4313_v7  ;;  %v214_v58 = vld [vmem:[%s5221_s3 + $0x210] sm:$0xff]  ;;  %v216_v62 = vld [vmem:[%s5221_s3 + $0x220] sm:$0xff] }
  0x4d   :  { %5485 = vst [vmem:[#allocation67_spill] sm:$0xff] %v4318_v10  ;;  %v246_v23 = vld [vmem:[%s5221_s3 + $0x310] sm:$0xff]  ;;  %v217_v48 = vld [vmem:[%s5221_s3 + $0x228] sm:$0xff] }
  0x4e   :  { %2788 = vmatpush3.bf16.msra.mxu0 %v4271_v49 }
  0x4f   :  { %2820 = vmatpush3.bf16.msra.mxu1 %v4275_v28  ;;  %2790 = vmatprep.subr.bf16.mxu0 %v4277_v56  ;;  %v176_v56 = vld [vmem:[%s5221_s3 + $0xe0] sm:$0xff] }
  0x50   :  { %2822 = vmatprep.subr.bf16.mxu1 %v4286_v30 }
  0x52   :  { %2792 = vmatpush3.bf16.msra.mxu0 %v4295_v47  ;;  %v188_v47 = vld [vmem:[%s5221_s3 + $0x140] sm:$0xff] }
  0x53   :  { %2824 = vmatpush3.bf16.msra.mxu1 %v4299_v29  ;;  %v157_v29 = vld [vmem:[%s5221_s3 + $0x48] sm:$0xff]  ;;  %2794 = vmatprep.subr.bf16.mxu0 %v4313_v7  ;;  %v4336_v61 = vpack.c.bf16 %v189_v59, %v188_v47  ;;  %v175_v7 = vld [vmem:[%s5221_s3 + $0xd8] sm:$0xff]  ;;  %v158_v59 = vld [vmem:[%s5221_s3 + $0x50] sm:$0xff] }
  0x54   :  { %v4330_v45 = vpack.c.bf16 %v157_v29, %v156_v15  ;;  %2826 = vmatprep.subr.bf16.mxu1 %v4318_v10  ;;  %v206_v29 = vld [vmem:[%s5221_s3 + $0x1d0] sm:$0xff]  ;;  %v4349_v15 = vpack.c.bf16 %v175_v7, %v174_v33  ;;  %v207_v47 = vld [vmem:[%s5221_s3 + $0x1d8] sm:$0xff] }
  0x55   :  { %5487 = vst [vmem:[#allocation69_spill] sm:$0xff] %v4336_v61  ;;  %v4360_v10 = vpack.c.bf16 %v207_v47, %v206_v29  ;;  %v190_v7 = vld [vmem:[%s5221_s3 + $0x150] sm:$0xff]  ;;  %v191_v33 = vld [vmem:[%s5221_s3 + $0x158] sm:$0xff]  ;;  %v208_v29 = vld [vmem:[%s5221_s3 + $0x1e0] sm:$0xff] }
  0x56   :  { %5486 = vst [vmem:[#allocation68_spill] sm:$0xff] %v4330_v45  ;;  %2796 = vmatpush3.bf16.msra.mxu0 %v4330_v45  ;;  %5488 = vst [vmem:[#allocation70_spill] sm:$0xff] %v4349_v15  ;;  %v159_v45 = vld [vmem:[%s5221_s3 + $0x58] sm:$0xff] }
  0x57   :  { %2828 = vmatpush3.bf16.msra.mxu1 %v4336_v61  ;;  %5489 = vst [vmem:[#allocation71_spill] sm:$0xff] %v4360_v10  ;;  %v4362_v30 = vpack.c.bf16 %v159_v45, %v158_v59  ;;  %2798 = vmatprep.subr.bf16.mxu0 %v4349_v15  ;;  %v4371_v61 = vpack.c.bf16 %v191_v33, %v190_v7  ;;  %v177_v45 = vld [vmem:[%s5221_s3 + $0xe8] sm:$0xff]  ;;  %v160_v7 = vld [vmem:[%s5221_s3 + $0x60] sm:$0xff] }
  0x58   :  { %2830 = vmatprep.subr.bf16.mxu1 %v4360_v10  ;;  %v4384_v47 = vpack.c.bf16 %v177_v45, %v176_v56  ;;  %v209_v59 = vld [vmem:[%s5221_s3 + $0x1e8] sm:$0xff]  ;;  %v192_v56 = vld [vmem:[%s5221_s3 + $0x160] sm:$0xff] }
  0x59   :  { %5490 = vst [vmem:[#allocation72_spill] sm:$0xff] %v4362_v30  ;;  %5491 = vst [vmem:[#allocation73_spill] sm:$0xff] %v4371_v61  ;;  %v161_v33 = vld [vmem:[%s5221_s3 + $0x68] sm:$0xff]  ;;  %v4396_v15 = vpack.c.bf16 %v209_v59, %v208_v29  ;;  %v179_v29 = vld [vmem:[%s5221_s3 + $0xf8] sm:$0xff] }
  0x5a   :  { %2800 = vmatpush3.bf16.msra.mxu0 %v4362_v30  ;;  %5492 = vst [vmem:[#allocation74_spill] sm:$0xff] %v4384_v47  ;;  %v4398_v10 = vpack.c.bf16 %v161_v33, %v160_v7  ;;  %v193_v45 = vld [vmem:[%s5221_s3 + $0x168] sm:$0xff]  ;;  %v178_v30 = vld [vmem:[%s5221_s3 + $0xf0] sm:$0xff]  ;;  %v211_v7 = vld [vmem:[%s5221_s3 + $0x1f8] sm:$0xff] }
  0x5b   :  { %2832 = vmatpush3.bf16.msra.mxu1 %v4371_v61  ;;  %5493 = vst [vmem:[#allocation75_spill] sm:$0xff] %v4396_v15  ;;  %2802 = vmatprep.subr.bf16.mxu0 %v4384_v47  ;;  %v4410_v28 = vpack.c.bf16 %v193_v45, %v192_v56  ;;  %v210_v59 = vld [vmem:[%s5221_s3 + $0x1f0] sm:$0xff]  ;;  %v4422_v33 = vpack.c.bf16 %v179_v29, %v178_v30  ;;  %v163_v45 = vld [vmem:[%s5221_s3 + $0x78] sm:$0xff] }
  0x5c   :  { %5494 = vst [vmem:[#allocation76_spill] sm:$0xff] %v4398_v10  ;;  %2834 = vmatprep.subr.bf16.mxu1 %v4396_v15  ;;  %v4424_v61 = vpack.c.bf16 %v211_v7, %v210_v59  ;;  %v162_v56 = vld [vmem:[%s5221_s3 + $0x70] sm:$0xff]  ;;  %v195_v30 = vld [vmem:[%s5221_s3 + $0x178] sm:$0xff]  ;;  %v228_v59 = vld [vmem:[%s5221_s3 + $0x280] sm:$0xff] }
  0x5d   :  { %5495 = vst [vmem:[#allocation77_spill] sm:$0xff] %v4410_v28  ;;  %5496 = vst [vmem:[#allocation78_spill] sm:$0xff] %v4422_v33  ;;  %v194_v47 = vld [vmem:[%s5221_s3 + $0x170] sm:$0xff]  ;;  %v4436_v49 = vpack.c.bf16 %v163_v45, %v162_v56  ;;  %v229_v7 = vld [vmem:[%s5221_s3 + $0x288] sm:$0xff] }
  0x5e   :  { %5497 = vst [vmem:[#allocation79_spill] sm:$0xff] %v4424_v61  ;;  %2804 = vmatpush3.bf16.msra.mxu0 %v4398_v10  ;;  %v4443_v29 = vpack.c.bf16 %v195_v30, %v194_v47  ;;  %v260_v56 = vld [vmem:[%s5221_s3 + $0x380] sm:$0xff]  ;;  %v4457_v47 = vpack.c.bf16 %v229_v7, %v228_v59  ;;  %v261_v45 = vld [vmem:[%s5221_s3 + $0x388] sm:$0xff] }
  0x5f   :  { %5498 = vst [vmem:[#allocation80_spill] sm:$0xff] %v4436_v49  ;;  %2836 = vmatpush3.bf16.msra.mxu1 %v4410_v28  ;;  %2806 = vmatprep.subr.bf16.mxu0 %v4422_v33  ;;  %v4462_v30 = vpack.c.bf16 %v261_v45, %v260_v56  ;;  %v4472_v59 = vld [vmem:[%s5220_s2] sm:$0xff] }
  0x60   :  { %5499 = vst [vmem:[#allocation81_spill] sm:$0xff] %v4443_v29  ;;  %2838 = vmatprep.subr.bf16.mxu1 %v4424_v61  ;;  %5500 = vst [vmem:[#allocation82_spill] sm:$0xff] %v4457_v47 }
  0x61   :  { %5501 = vst [vmem:[#allocation83_spill] sm:$0xff] %v4462_v30 }
  0x62   :  { %2808 = vmatpush3.bf16.msra.mxu0 %v4436_v49  ;;  %v277_v49 = vlaneseq }
  0x63   :  { %2840 = vmatpush3.bf16.msra.mxu1 %v4443_v29  ;;  %2842 = vmatprep.subr.bf16.mxu0 %v4457_v47 }
  0x64   :  { %2874 = vmatprep.subr.bf16.mxu1 %v4462_v30  ;;  %v4466_v61 = vshrl.u32 %v277_v49, 7 }
  0x66   :  { %v279_v33 = vsub.s32 0, %v4466_v61  ;;  %v287_v7 = vsub.s32 2, %v4466_v61  ;;  %v283_v29 = vsub.s32 1, %v4466_v61  ;;  %v291_v56 = vsub.s32 3, %v4466_v61 }
  0x67   :  { %v307_v41 = vsub.s32 7, %v4466_v61 }
  0x68   :  { %v4478_v45 = vrot.slane %v4472_v59, %v279_v33  ;;  %v4481_v30 = vrot.slane %v4472_v59, %v287_v7  ;;  %v4484_v49 = vrot.slane %v4472_v59, %v283_v29  ;;  %v4487_v47 = vrot.slane %v4472_v59, %v291_v56  ;;  %v212_v29 = vld [vmem:[%s5221_s3 + $0x200] sm:$0xff]  ;;  %v262_v56 = vld [vmem:[%s5221_s3 + $0x390] sm:$0xff] }
  0x6a   :  { %5502 = vst [vmem:[#allocation84_spill] sm:$0xff] %v4478_v45  ;;  %5503 = vst [vmem:[#allocation85_spill] sm:$0xff] %v4481_v30 }
  0x6b   :  { %5504 = vst [vmem:[#allocation86_spill] sm:$0xff] %v4484_v49  ;;  %5505 = vst [vmem:[#allocation87_spill] sm:$0xff] %v4487_v47 }
  0xf8   :  { %v383_v28 = vpop.f32.mrb[0].mxu0 }
  0xf9   :  { %v384_v10 = vadd.f32 %v383_v28, %v4478_v45  ;;  %v454_v15 = vpop.f32.mrb[0].mxu1  ;;  %v385_v21 = vpop.f32.mrb[1].mxu0  ;;  %v213_v28 = vld [vmem:[%s5221_s3 + $0x208] sm:$0xff] }
  0xfa   :  { %v455_v46 = vadd.f32 %v454_v15, %v4481_v30  ;;  %v386_v32 = vadd.f32 %v385_v21, %v4484_v49  ;;  %v456_v33 = vpop.f32.mrb[1].mxu1  ;;  %v244_v15 = vld [vmem:[%s5221_s3 + $0x300] sm:$0xff]  ;;  %v245_v21 = vld [vmem:[%s5221_s3 + $0x308] sm:$0xff]  ;;  %v4521_v30 = vpack.c.bf16 %v213_v28, %v212_v29 }
  0xfb   :  { %3451 = vtanh.f32 %v384_v10  ;;  %v457_v7 = vadd.f32 %v456_v33, %v4487_v47  ;;  %v263_v33 = vld [vmem:[%s5221_s3 + $0x398] sm:$0xff]  ;;  %v4525_v49 = vpack.c.bf16 %v245_v21, %v244_v15  ;;  %v232_v21 = vld [vmem:[%s5221_s3 + $0x2a0] sm:$0xff] }
  0xfc   :  { %3453 = vtanh.f32 %v455_v46  ;;  %v230_v46 = vld [vmem:[%s5221_s3 + $0x290] sm:$0xff]  ;;  %5506 = vst [vmem:[#allocation88_spill] sm:$0xff] %v4521_v30  ;;  %v4541_v28 = vpack.c.bf16 %v263_v33, %v262_v56  ;;  %v247_v15 = vld [vmem:[%s5221_s3 + $0x318] sm:$0xff]  ;;  %v265_v56 = vld [vmem:[%s5221_s3 + $0x3a8] sm:$0xff]  ;;  %v4562_v33 = vpack.c.bf16 %v215_v5, %v214_v58 }
  0xfd   :  { %3455 = vtanh.f32 %v386_v32  ;;  %v231_v32 = vld [vmem:[%s5221_s3 + $0x298] sm:$0xff]  ;;  %5507 = vst [vmem:[#allocation89_spill] sm:$0xff] %v4525_v49  ;;  %v4566_v4 = vpack.c.bf16 %v247_v15, %v246_v23  ;;  %v248_v5 = vld [vmem:[%s5221_s3 + $0x320] sm:$0xff]  ;;  %v249_v23 = vld [vmem:[%s5221_s3 + $0x328] sm:$0xff] }
  0xfe   :  { %3457 = vtanh.f32 %v457_v7  ;;  %v4527_v45 = vpack.c.bf16 %v231_v32, %v230_v46  ;;  %5509 = vst [vmem:[#allocation91_spill] sm:$0xff] %v4541_v28  ;;  %v233_v46 = vld [vmem:[%s5221_s3 + $0x2a8] sm:$0xff]  ;;  %v264_v32 = vld [vmem:[%s5221_s3 + $0x3a0] sm:$0xff]  ;;  %5510 = vst [vmem:[#allocation92_spill] sm:$0xff] %v4562_v33 }
  0xff   :  { %5511 = vst [vmem:[#allocation93_spill] sm:$0xff] %v4566_v4  ;;  %v4568_v2 = vpack.c.bf16 %v233_v46, %v232_v21  ;;  %v4580_v58 = vpack.c.bf16 %v265_v56, %v264_v32  ;;  %v234_v15 = vld [vmem:[%s5221_s3 + $0x2b0] sm:$0xff]  ;;  %v235_v21 = vld [vmem:[%s5221_s3 + $0x2b8] sm:$0xff]  ;;  %v4598_v56 = vpack.c.bf16 %v217_v48, %v216_v62 }
 0x100   :  { %5508 = vst [vmem:[#allocation90_spill] sm:$0xff] %v4527_v45  ;;  %v266_v46 = vld [vmem:[%s5221_s3 + $0x3b0] sm:$0xff]  ;;  %v267_v32 = vld [vmem:[%s5221_s3 + $0x3b8] sm:$0xff] }
 0x101   :  { %5512 = vst [vmem:[#allocation94_spill] sm:$0xff] %v4568_v2  ;;  %5513 = vst [vmem:[#allocation95_spill] sm:$0xff] %v4580_v58  ;;  %v250_v48 = vld [vmem:[%s5221_s3 + $0x330] sm:$0xff]  ;;  %v4616_v62 = vpack.c.bf16 %v267_v32, %v266_v46  ;;  %v269_v46 = vld [vmem:[%s5221_s3 + $0x3c8] sm:$0xff] }
 0x102   :  { %5514 = vst [vmem:[#allocation96_spill] sm:$0xff] %v4598_v56 }
 0x103   :  { %5517 = vst [vmem:[#allocation99_spill] sm:$0xff] %v4616_v62 }
 0x105   :  { %v4511_v10 = vpop.eup %3451 }
 0x106   :  { %v4519_v7 = vpop.eup %3453 }
 0x107   :  { %v4523_v47 = vpop.eup %3455 }
 0x108   :  { %v4538_v29 = vpop.eup %3457  ;;  %673 = vmatprep.mubr.f32.mxu0 %v4523_v47 }
 0x109   :  { %743 = vmatprep.mubr.f32.mxu1 %v4538_v29  ;;  %674 = vmatmul.mubr.f32.vlgmr.msra.gmra.mrb[4].mxu0 %v4511_v10 }
 0x10a   :  { %744 = vmatmul.mubr.f32.vlgmr.msra.gmra.mrb[4].mxu1 %v4519_v7  ;;  %2844 = vmatpush3.bf16.msra.mxu0 %v4521_v30  ;;  %v219_v30 = vld [vmem:[%s5221_s3 + $0x238] sm:$0xff] }
 0x10b   :  { %2876 = vmatpush3.bf16.msra.mxu1 %v4525_v49  ;;  %2846 = vmatprep.subr.bf16.mxu0 %v4527_v45  ;;  %v4604_v45 = vpack.c.bf16 %v235_v21, %v234_v15  ;;  %v218_v49 = vld [vmem:[%s5221_s3 + $0x230] sm:$0xff]  ;;  %v237_v15 = vld [vmem:[%s5221_s3 + $0x2c8] sm:$0xff]  ;;  %v295_v21 = vsub.s32 4, %v4466_v61 }
 0x10c   :  { %2878 = vmatprep.subr.bf16.mxu1 %v4541_v28  ;;  %v4602_v28 = vpack.c.bf16 %v249_v23, %v248_v5  ;;  %v251_v5 = vld [vmem:[%s5221_s3 + $0x338] sm:$0xff]  ;;  %v236_v23 = vld [vmem:[%s5221_s3 + $0x2c0] sm:$0xff]  ;;  %v4635_v32 = vpack.c.bf16 %v219_v30, %v218_v49  ;;  %v221_v30 = vld [vmem:[%s5221_s3 + $0x248] sm:$0xff] }
 0x10d   :  { %5516 = vst [vmem:[#allocation98_spill] sm:$0xff] %v4604_v45  ;;  %v4643_v42 = vpack.c.bf16 %v237_v15, %v236_v23  ;;  %v252_v49 = vld [vmem:[%s5221_s3 + $0x340] sm:$0xff]  ;;  %v239_v23 = vld [vmem:[%s5221_s3 + $0x2d8] sm:$0xff]  ;;  %v4668_v15 = vrot.slane %v4472_v59, %v295_v21  ;;  %v4688_v21 = vrot.slane %v4472_v59, %v307_v41 }
 0x10e   :  { %2848 = vmatpush3.bf16.msra.mxu0 %v4562_v33  ;;  %5515 = vst [vmem:[#allocation97_spill] sm:$0xff] %v4602_v28  ;;  %5518 = vst [vmem:[#allocation100_spill] sm:$0xff] %v4635_v32  ;;  %v4641_v33 = vpack.c.bf16 %v251_v5, %v250_v48  ;;  %v238_v5 = vld [vmem:[%s5221_s3 + $0x2d0] sm:$0xff] }
 0x10f   :  { %2880 = vmatpush3.bf16.msra.mxu1 %v4566_v4  ;;  %2850 = vmatprep.subr.bf16.mxu0 %v4568_v2  ;;  %v303_v2 = vsub.s32 6, %v4466_v61  ;;  %v299_v4 = vsub.s32 5, %v4466_v61  ;;  %5520 = vst [vmem:[#allocation102_spill] sm:$0xff] %v4643_v42  ;;  %v253_v61 = vld [vmem:[%s5221_s3 + $0x348] sm:$0xff]  ;;  %5522 = vst [vmem:[#allocation104_spill] sm:$0xff] %v4668_v15  ;;  %v4692_v24 = vpack.c.bf16 %v239_v23, %v238_v5 }
 0x110   :  { %2882 = vmatprep.subr.bf16.mxu1 %v4580_v58  ;;  %v268_v58 = vld [vmem:[%s5221_s3 + $0x3c0] sm:$0xff]  ;;  %5519 = vst [vmem:[#allocation101_spill] sm:$0xff] %v4641_v33  ;;  %v4690_v38 = vpack.c.bf16 %v253_v61, %v252_v49  ;;  %v241_v61 = vld [vmem:[%s5221_s3 + $0x2e8] sm:$0xff] }
 0x111   :  { %v4656_v48 = vpack.c.bf16 %v269_v46, %v268_v58  ;;  %v270_v58 = vld [vmem:[%s5221_s3 + $0x3d0] sm:$0xff]  ;;  %v271_v46 = vld [vmem:[%s5221_s3 + $0x3d8] sm:$0xff]  ;;  %v240_v49 = vld [vmem:[%s5221_s3 + $0x2e0] sm:$0xff] }
 0x112   :  { %2852 = vmatpush3.bf16.msra.mxu0 %v4598_v56  ;;  %v220_v56 = vld [vmem:[%s5221_s3 + $0x240] sm:$0xff]  ;;  %v4704_v41 = vpack.c.bf16 %v271_v46, %v270_v58  ;;  %v273_v46 = vld [vmem:[%s5221_s3 + $0x3e8] sm:$0xff]  ;;  %v4732_v12 = vpack.c.bf16 %v241_v61, %v240_v49  ;;  %v243_v49 = vld [vmem:[%s5221_s3 + $0x2f8] sm:$0xff] }
 0x113   :  { %2884 = vmatpush3.bf16.msra.mxu1 %v4602_v28  ;;  %2854 = vmatprep.subr.bf16.mxu0 %v4604_v45  ;;  %5521 = vst [vmem:[#allocation103_spill] sm:$0xff] %v4656_v48  ;;  %v4681_v45 = vrot.slane %v4472_v59, %v299_v4  ;;  %v4683_v28 = vpack.c.bf16 %v221_v30, %v220_v56  ;;  %v223_v4 = vld [vmem:[%s5221_s3 + $0x258] sm:$0xff]  ;;  %v254_v56 = vld [vmem:[%s5221_s3 + $0x350] sm:$0xff]  ;;  %v272_v58 = vld [vmem:[%s5221_s3 + $0x3e0] sm:$0xff] }
 0x114   :  { %2886 = vmatprep.subr.bf16.mxu1 %v4616_v62  ;;  %v4678_v62 = vrot.slane %v4472_v59, %v303_v2  ;;  %v222_v2 = vld [vmem:[%s5221_s3 + $0x250] sm:$0xff]  ;;  %v255_v59 = vld [vmem:[%s5221_s3 + $0x358] sm:$0xff] }
 0x115   :  { %v4725_v14 = vpack.c.bf16 %v223_v4, %v222_v2  ;;  %v225_v2 = vld [vmem:[%s5221_s3 + $0x268] sm:$0xff]  ;;  %v4744_v4 = vpack.c.bf16 %v273_v46, %v272_v58  ;;  %v275_v61 = vld [vmem:[%s5221_s3 + $0x3f8] sm:$0xff]  ;;  %v226_v58 = vld [vmem:[%s5221_s3 + $0x270] sm:$0xff] }
 0x116   :  { %2856 = vmatpush3.bf16.msra.mxu0 %v4635_v32  ;;  %v227_v46 = vld [vmem:[%s5221_s3 + $0x278] sm:$0xff] }
 0x117   :  { %2888 = vmatpush3.bf16.msra.mxu1 %v4641_v33  ;;  %2858 = vmatprep.subr.bf16.mxu0 %v4643_v42 }
 0x118   :  { %v525_v30 = vpop.f32.mrb[2].mxu0  ;;  %2890 = vmatprep.subr.bf16.mxu1 %v4656_v48 }
 0x119   :  { %v526_v5 = vadd.f32 %v525_v30, %v4668_v15  ;;  %v596_v23 = vpop.f32.mrb[2].mxu1  ;;  %v527_v42 = vpop.f32.mrb[3].mxu0  ;;  %v4730_v15 = vpack.c.bf16 %v255_v59, %v254_v56  ;;  %v257_v56 = vld [vmem:[%s5221_s3 + $0x368] sm:$0xff]  ;;  %v242_v59 = vld [vmem:[%s5221_s3 + $0x2f0] sm:$0xff] }
 0x11a   :  { %v597_v48 = vadd.f32 %v596_v23, %v4678_v62  ;;  %v528_v33 = vadd.f32 %v527_v42, %v4681_v45  ;;  %v598_v32 = vpop.f32.mrb[3].mxu1  ;;  %2860 = vmatpush3.bf16.msra.mxu0 %v4683_v28  ;;  %v224_v42 = vld [vmem:[%s5221_s3 + $0x260] sm:$0xff] }
 0x11b   :  { %3459 = vtanh.f32 %v526_v5  ;;  %v599_v30 = vadd.f32 %v598_v32, %v4688_v21  ;;  %2892 = vmatpush3.bf16.msra.mxu1 %v4690_v38  ;;  %2862 = vmatprep.subr.bf16.mxu0 %v4692_v24  ;;  %v256_v32 = vld [vmem:[%s5221_s3 + $0x360] sm:$0xff]  ;;  %v4762_v5 = vpack.c.bf16 %v225_v2, %v224_v42  ;;  %v258_v42 = vld [vmem:[%s5221_s3 + $0x370] sm:$0xff]  ;;  %v259_v2 = vld [vmem:[%s5221_s3 + $0x378] sm:$0xff] }
 0x11c   :  { %3461 = vtanh.f32 %v597_v48  ;;  %2894 = vmatprep.subr.bf16.mxu1 %v4704_v41  ;;  %v274_v48 = vld [vmem:[%s5221_s3 + $0x3f0] sm:$0xff]  ;;  %v4766_v23 = vpack.c.bf16 %v257_v56, %v256_v32  ;;  %v4786_v32 = vpack.c.bf16 %v227_v46, %v226_v58  ;;  %v4790_v56 = vpack.c.bf16 %v259_v2, %v258_v42 }
 0x11d   :  { %3463 = vtanh.f32 %v528_v33  ;;  %v4768_v33 = vpack.c.bf16 %v243_v49, %v242_v59  ;;  %v5523_v58 = vmov 0.0  }
 0x11e   :  { %3465 = vtanh.f32 %v599_v30  ;;  %2864 = vmatpush3.bf16.msra.mxu0 %v4725_v14  ;;  %v4777_v30 = vpack.c.bf16 %v275_v61, %v274_v48 }
 0x11f   :  { %2896 = vmatpush3.bf16.msra.mxu1 %v4730_v15  ;;  %2866 = vmatprep.subr.bf16.mxu0 %v4732_v12 }
 0x120   :  { %2898 = vmatprep.subr.bf16.mxu1 %v4744_v4 }
 0x122   :  { %2868 = vmatpush3.bf16.msra.mxu0 %v4762_v5 }
 0x123   :  { %2900 = vmatpush3.bf16.msra.mxu1 %v4766_v23  ;;  %2870 = vmatprep.subr.bf16.mxu0 %v4768_v33 }
 0x124   :  { %2902 = vmatprep.subr.bf16.mxu1 %v4777_v30 }
 0x125   :  { %v4793_v59 = vpop.eup %3459 }
 0x126   :  { %v4795_v49 = vpop.eup %3461  ;;  %2872 = vmatpush3.bf16.msra.mxu0 %v4786_v32 }
 0x127   :  { %v4798_v48 = vpop.eup %3463  ;;  %2904 = vmatpush3.bf16.msra.mxu1 %v4790_v56  ;;  %2906 = vmatprep.subr.bf16.mxu0 %v3580_v3 }
 0x128   :  { %v4802_v61 = vpop.eup %3465  ;;  %813 = vmatprep.mubr.f32.mxu0 %v4798_v48  ;;  %2938 = vmatprep.subr.bf16.mxu1 %v3593_v8 }
 0x129   :  { %883 = vmatprep.mubr.f32.mxu1 %v4802_v61  ;;  %814 = vmatmul.mubr.f32.vlgmr.msra.gmra.mrb[6].mxu0 %v4793_v59 }
 0x12a   :  { %884 = vmatmul.mubr.f32.vlgmr.msra.gmra.mrb[6].mxu1 %v4795_v49  ;;  %2908 = vmatpush1.bf16.msra.mxu0 %v3595_v9 }
 0x12b   :  { %2940 = vmatpush1.bf16.msra.mxu1 %v3607_v13  ;;  %2910 = vmatprep.subr.bf16.mxu0 %v3620_v17 }
 0x12c   :  { %2942 = vmatprep.subr.bf16.mxu1 %v3622_v18  ;;  %1014 = vmatprep.mubr.f32.mxu0 %v5523_v58 }
 0x12d   :  { %1085 = vmatprep.mubr.f32.mxu1 %v5523_v58 }
 0x12e   :  { %2912 = vmatpush1.bf16.msra.mxu0 %v3634_v22 }
 0x12f   :  { %2944 = vmatpush1.bf16.msra.mxu1 %v3647_v26  ;;  %2914 = vmatprep.subr.bf16.mxu0 %v3649_v27 }
 0x130   :  { %2946 = vmatprep.subr.bf16.mxu1 %v3660_v31 }
 0x132   :  { %2916 = vmatpush1.bf16.msra.mxu0 %v3672_v35 }
 0x133   :  { %2948 = vmatpush1.bf16.msra.mxu1 %v3685_v39  ;;  %2918 = vmatprep.subr.bf16.mxu0 %v3687_v40 }
 0x134   :  { %2950 = vmatprep.subr.bf16.mxu1 %v3699_v44 }
 0x136   :  { %2920 = vmatpush1.bf16.msra.mxu0 %v3720_v51 }
 0x137   :  { %2952 = vmatpush1.bf16.msra.mxu1 %v3724_v52  ;;  %2922 = vmatprep.subr.bf16.mxu0 %v3726_v53 }
 0x138   :  { %2954 = vmatprep.subr.bf16.mxu1 %v3738_v57 }
 0x13a   :  { %2924 = vmatpush1.bf16.msra.mxu0 %v3756_v63 }
 0x13b   :  { %2956 = vmatpush1.bf16.msra.mxu1 %v3760_v0  ;;  %2926 = vmatprep.subr.bf16.mxu0 %v3762_v1 }
 0x13c   :  { %2958 = vmatprep.subr.bf16.mxu1 %v3774_v6 }
 0x13e   :  { %2928 = vmatpush1.bf16.msra.mxu0 %v3792_v16 }
 0x13f   :  { %2960 = vmatpush1.bf16.msra.mxu1 %v3796_v19  ;;  %2930 = vmatprep.subr.bf16.mxu0 %v3798_v20 }
 0x140   :  { %2962 = vmatprep.subr.bf16.mxu1 %v3810_v25 }
 0x142   :  { %2932 = vmatpush1.bf16.msra.mxu0 %v3828_v34 }
 0x143   :  { %2964 = vmatpush1.bf16.msra.mxu1 %v3832_v36  ;;  %2934 = vmatprep.subr.bf16.mxu0 %v3834_v37 }
 0x144   :  { %2966 = vmatprep.subr.bf16.mxu1 %v3846_v43 }
 0x146   :  { %2936 = vmatpush1.bf16.msra.mxu0 %v3864_v50 }
 0x147   :  { %2968 = vmatpush1.bf16.msra.mxu1 %v3868_v54  ;;  %2970 = vmatprep.subr.bf16.mxu0 %v3870_v55 }
 0x148   :  { %3002 = vmatprep.subr.bf16.mxu1 %v3882_v60 }
 0x1dc   :  { %v2261_v46 = vpop.f32.mrb[4].mxu0 }
 0x1dd   :  { %v2296_v42 = vpop.f32.mrb[4].mxu1  ;;  %v2262_v2 = vpop.f32.mrb[5].mxu0 }
 0x1de   :  { %v2263_v25 = vadd.f32 %v2262_v2, %v2261_v46  ;;  %v2297_v20 = vpop.f32.mrb[5].mxu1  ;;  %v3511_v2 = vld [vmem:[%s5218_s0] sm:$0xff]  ;;  %s3545_s0 = smov [#allocation2]  }
 0x1df   :  { %v2298_v34 = vadd.f32 %v2297_v20, %v2296_v42  ;;  %s2221_s23 = sshll.u32 %s3545_s0, 4  ;;  %s2222_s23 = int_to_ptr.vmem [resolvable:$true] %s2221_s23 }
 0x1e0   :  { %s3512_s24 = scalar_lea.vmem %s2222_s23, 128  ;;  %p3517_p1 = scmp.lt.s32.totalorder %s2222_s23, %s2222_s23 }
 0x1e1   :  { %v746_v19 = vadd.f32 %v2298_v34, %v2263_v25  ;;  %v5409_v25 = vmov 2   ;;  %v5420_v34 = vmov 0   ;;  %p3513_p0 = scmp.ne.s32.totalorder %s2222_s23, %s3512_s24  ;;  %p3518_p2 = scmp.lt.s32.totalorder %s3512_s24, %s3512_s24 }
 0x1e2   :  { %3429 = vset.pattern.permute.xlu0 %v5409_v25  ;;  %3427 = vset.pattern.permute.xlu1 %v5420_v34 }
 0x1e3   :  { %p3519_p3 = por %p3518_p2, %p3517_p1 }
 0x1e5   :  { %p3520_p4 = pnand %p3519_p3, %p3513_p0 }
 0x1fc   :  { %v2331_v36 = vpop.f32.mrb[6].mxu0 }
 0x1fd   :  { %v2366_v16 = vpop.f32.mrb[6].mxu1  ;;  %v2332_v37 = vpop.f32.mrb[7].mxu0 }
 0x1fe   :  { %v2333_v6 = vadd.f32 %v2332_v37, %v2331_v36  ;;  %v2367_v43 = vpop.f32.mrb[7].mxu1  ;;  %v5414_v36 = vmov 5   ;;  %v5412_v37 = vmov 6  }
 0x1ff   :  { %v2368_v1 = vadd.f32 %v2367_v43, %v2366_v16  ;;  %v5410_v43 = vmov 7  }
 0x200   :  { %v816_v50 = vadd.f32 %v2333_v6, %v746_v19  ;;  %v5421_v19 = vmov 1  }
 0x202   :  { %v886_v54 = vadd.f32 %v2368_v1, %v816_v50 }
 0x204   :  { %v890_v55 = vsel %vm889_vm0, %v886_v54, -inf }
 0x205   :  { %891 = vmax.xlane.f32.xlu0 %v890_v55 }
 0x292   :  { %v892_v60 = vpop.xlane.xlu0 %891 }
 0x293   :  { %v893_v0 = vsub.f32 %v886_v54, %v892_v60 }
 0x295   :  { %v894_v63 = vmul.f32 1.442695, %v893_v0  ;;  %v5416_v0 = vmov 4  }
 0x297   :  { %3467 = vpow2.f32 %v894_v63  ;;  %v5418_v63 = vmov 3  }
 0x2a1   :  { %v3468_v46 = vpop.eup %3467 }
 0x2a2   :  { %v896_v20 = vsel %vm889_vm0, %v3468_v46, 0.0 }
 0x2a3   :  { %897 = vadd.xlane.f32.xlu0 %v896_v20 }
 0x330   :  { %v898_v6 = vpop.xlane.xlu0 %897 }
 0x331   :  { %3469 = vrcp.f32 %v898_v6 }
 0x33b   :  { %v3470_v1 = vpop.eup %3469 }
 0x33c   :  { %v900_v16 = vmul.f32 %v3470_v1, %v3468_v46 }
 0x33e   :  { %915 = vperm.xlu0 %3429, %v900_v16   ;;  %903 = vperm.xlu1 %3427, %v900_v16  }
 0x342   :  { %3428 = vset.pattern.permute.xlu1 %v5421_v19  ;;  %v5549_v19 = vld [vmem:[#allocation46_spill] sm:$0xff] }
 0x343   :  { %909 = vperm.xlu1 %3428, %v900_v16  }
 0x347   :  { %3430 = vset.pattern.permute.xlu1 %v5418_v63 }
 0x348   :  { %921 = vperm.xlu1 %3430, %v900_v16  }
 0x34c   :  { %3431 = vset.pattern.permute.xlu1 %v5416_v0 }
 0x34d   :  { %927 = vperm.xlu1 %3431, %v900_v16  }
 0x351   :  { %3432 = vset.pattern.permute.xlu1 %v5414_v36 }
 0x352   :  { %933 = vperm.xlu1 %3432, %v900_v16  }
 0x356   :  { %3433 = vset.pattern.permute.xlu1 %v5412_v37 }
 0x357   :  { %939 = vperm.xlu1 %3433, %v900_v16  }
 0x35b   :  { %3434 = vset.pattern.permute.xlu1 %v5410_v43 }
 0x35c   :  { %945 = vperm.xlu1 %3434, %v900_v16  }
 0x360   :  { %3435 = vset.pattern.permute.xlu1 %v5420_v34  ;;  %v5548_v34 = vld [vmem:[#allocation45_spill] sm:$0xff] }
 0x3bd   :  { %v904_v50 = vpop.permute.xlu1 %903  ;;  %v916_v6 = vpop.permute.xlu0 %915 }
 0x3be   :  { %v906_v60 = vmul.f32 %v4511_v10, %v904_v50  ;;  %v918_v25 = vmul.f32 %v4519_v7, %v916_v6  ;;  %v5524_v7 = vld [vmem:[#allocation21_spill] sm:$0xff]  ;;  %v5538_v6 = vld [vmem:[#allocation35_spill] sm:$0xff] }
 0x3c0   :  { %v907_v46 = vadd.f32 %v3511_v2, %v906_v60 }
 0x3c2   :  { %v910_v54 = vpop.permute.xlu1 %909 }
 0x3c3   :  { %v912_v42 = vmul.f32 %v4523_v47, %v910_v54 }
 0x3c5   :  { %v913_v1 = vadd.f32 %v912_v42, %v907_v46 }
 0x3c7   :  { %v922_v55 = vpop.permute.xlu1 %921  ;;  %v919_v43 = vadd.f32 %v918_v25, %v913_v1  ;;  %v5530_v25 = vld [vmem:[#allocation27_spill] sm:$0xff]  ;;  %v5539_v1 = vld [vmem:[#allocation36_spill] sm:$0xff] }
 0x3c8   :  { %v924_v37 = vmul.f32 %v4538_v29, %v922_v55  ;;  %v5525_v29 = vld [vmem:[#allocation22_spill] sm:$0xff]  ;;  %v5536_v55 = vld [vmem:[#allocation33_spill] sm:$0xff] }
 0x3ca   :  { %v925_v0 = vadd.f32 %v924_v37, %v919_v43  ;;  %v5534_v37 = vld [vmem:[#allocation31_spill] sm:$0xff]  ;;  %v5535_v43 = vld [vmem:[#allocation32_spill] sm:$0xff] }
 0x3cc   :  { %v928_v20 = vpop.permute.xlu1 %927 }
 0x3cd   :  { %v930_v36 = vmul.f32 %v4793_v59, %v928_v20  ;;  %v5526_v59 = vld [vmem:[#allocation23_spill] sm:$0xff]  ;;  %v5537_v20 = vld [vmem:[#allocation34_spill] sm:$0xff] }
 0x3cf   :  { %v931_v50 = vadd.f32 %v930_v36, %v925_v0  ;;  %v5532_v0 = vld [vmem:[#allocation29_spill] sm:$0xff]  ;;  %v5533_v36 = vld [vmem:[#allocation30_spill] sm:$0xff] }
 0x3d1   :  { %v934_v16 = vpop.permute.xlu1 %933 }
 0x3d2   :  { %v936_v10 = vmul.f32 %v4798_v48, %v934_v16  ;;  %v5528_v48 = vld [vmem:[#allocation25_spill] sm:$0xff] }
 0x3d3   :  { %v5540_v16 = vld [vmem:[#allocation37_spill] sm:$0xff] }
 0x3d4   :  { %v937_v63 = vadd.f32 %v936_v10, %v931_v50  ;;  %v5541_v10 = vld [vmem:[#allocation38_spill] sm:$0xff]  ;;  %v5543_v50 = vld [vmem:[#allocation40_spill] sm:$0xff] }
 0x3d6   :  { %v940_v47 = vpop.permute.xlu1 %939 }
 0x3d7   :  { %v942_v54 = vmul.f32 %v4795_v49, %v940_v47  ;;  %v5527_v49 = vld [vmem:[#allocation24_spill] sm:$0xff]  ;;  %v5542_v47 = vld [vmem:[#allocation39_spill] sm:$0xff] }
 0x3d9   :  { %v943_v2 = vadd.f32 %v942_v54, %v937_v63  ;;  %v5531_v63 = vld [vmem:[#allocation28_spill] sm:$0xff]  ;;  %v5544_v54 = vld [vmem:[#allocation41_spill] sm:$0xff] }
 0x3db   :  { %v946_v60 = vpop.permute.xlu1 %945 }
 0x3dc   :  { %v948_v42 = vmul.f32 %v4802_v61, %v946_v60  ;;  %v5529_v61 = vld [vmem:[#allocation26_spill] sm:$0xff] }
 0x3dd   :  { %v5545_v60 = vld [vmem:[#allocation42_spill] sm:$0xff] }
 0x3de   :  { %v4865_v46 = vadd.f32 %v948_v42, %v943_v2  ;;  %v5546_v2 = vld [vmem:[#allocation43_spill] sm:$0xff]  ;;  %v5547_v42 = vld [vmem:[#allocation44_spill] sm:$0xff] }
 0x3e0   :  { %1015 = vmatmul.mubr.f32.vlgmr.msra.gmra.mrb[8].mxu0 %v4865_v46  ;;  %1086 = vmatmul.mubr.f32.vlgmr.msra.gmra.mrb[8].mxu1 %v4865_v46 }
 0x3e1   :  { %2972 = vmatpush1.bf16.msra.mxu0 %v3905_v11  ;;  %3004 = vmatpush1.bf16.msra.mxu1 %v5524_v7 }
 0x3e2   :  { %2974 = vmatprep.subr.bf16.mxu0 %v5525_v29  ;;  %3006 = vmatprep.subr.bf16.mxu1 %v5526_v59 }
 0x3e3   :  { %1156 = vmatprep.mubr.f32.mxu0 %v5523_v58  ;;  %1227 = vmatprep.mubr.f32.mxu1 %v5523_v58 }
 0x3e5   :  { %2976 = vmatpush1.bf16.msra.mxu0 %v5527_v49  ;;  %3008 = vmatpush1.bf16.msra.mxu1 %v5528_v48 }
 0x3e6   :  { %2978 = vmatprep.subr.bf16.mxu0 %v5529_v61  ;;  %3010 = vmatprep.subr.bf16.mxu1 %v5530_v25 }
 0x3e9   :  { %2980 = vmatpush1.bf16.msra.mxu0 %v5531_v63  ;;  %3012 = vmatpush1.bf16.msra.mxu1 %v5532_v0 }
 0x3ea   :  { %2982 = vmatprep.subr.bf16.mxu0 %v5533_v36  ;;  %3014 = vmatprep.subr.bf16.mxu1 %v5534_v37  ;;  %v5590_v37 = vld [vmem:[#allocation85_spill] sm:$0xff] }
 0x3ed   :  { %2984 = vmatpush1.bf16.msra.mxu0 %v5535_v43  ;;  %3016 = vmatpush1.bf16.msra.mxu1 %v5536_v55  ;;  %v5588_v55 = vld [vmem:[#allocation86_spill] sm:$0xff]  ;;  %v5589_v43 = vld [vmem:[#allocation87_spill] sm:$0xff] }
 0x3ee   :  { %2986 = vmatprep.subr.bf16.mxu0 %v5537_v20  ;;  %3018 = vmatprep.subr.bf16.mxu1 %v5538_v6  ;;  %v5587_v6 = vld [vmem:[#allocation84_spill] sm:$0xff] }
 0x3f1   :  { %2988 = vmatpush1.bf16.msra.mxu0 %v5539_v1  ;;  %3020 = vmatpush1.bf16.msra.mxu1 %v5540_v16  ;;  %v5550_v1 = vld [vmem:[#allocation47_spill] sm:$0xff]  ;;  %v5551_v16 = vld [vmem:[#allocation48_spill] sm:$0xff] }
 0x3f2   :  { %2990 = vmatprep.subr.bf16.mxu0 %v5541_v10  ;;  %3022 = vmatprep.subr.bf16.mxu1 %v5542_v47  ;;  %v5552_v10 = vld [vmem:[#allocation49_spill] sm:$0xff]  ;;  %v5553_v47 = vld [vmem:[#allocation50_spill] sm:$0xff] }
 0x3f5   :  { %2992 = vmatpush1.bf16.msra.mxu0 %v5543_v50  ;;  %3024 = vmatpush1.bf16.msra.mxu1 %v5544_v54  ;;  %v5554_v50 = vld [vmem:[#allocation51_spill] sm:$0xff]  ;;  %v5565_v54 = vld [vmem:[#allocation62_spill] sm:$0xff] }
 0x3f6   :  { %2994 = vmatprep.subr.bf16.mxu0 %v5545_v60  ;;  %3026 = vmatprep.subr.bf16.mxu1 %v5546_v2  ;;  %v5555_v2 = vld [vmem:[#allocation52_spill] sm:$0xff]  ;;  %v5564_v60 = vld [vmem:[#allocation61_spill] sm:$0xff] }
 0x3f9   :  { %2996 = vmatpush1.bf16.msra.mxu0 %v5547_v42  ;;  %3028 = vmatpush1.bf16.msra.mxu1 %v5548_v34  ;;  %v5556_v42 = vld [vmem:[#allocation53_spill] sm:$0xff]  ;;  %v5557_v34 = vld [vmem:[#allocation54_spill] sm:$0xff] }
 0x3fa   :  { %2998 = vmatprep.subr.bf16.mxu0 %v5549_v19  ;;  %3030 = vmatprep.subr.bf16.mxu1 %v5550_v1  ;;  %v5558_v19 = vld [vmem:[#allocation55_spill] sm:$0xff]  ;;  %v5559_v1 = vld [vmem:[#allocation56_spill] sm:$0xff] }
 0x3fd   :  { %3000 = vmatpush1.bf16.msra.mxu0 %v5551_v16  ;;  %3032 = vmatpush1.bf16.msra.mxu1 %v5552_v10  ;;  %v5560_v16 = vld [vmem:[#allocation57_spill] sm:$0xff]  ;;  %v5561_v10 = vld [vmem:[#allocation58_spill] sm:$0xff] }
 0x3fe   :  { %3034 = vmatprep.subr.bf16.mxu0 %v5553_v47  ;;  %3066 = vmatprep.subr.bf16.mxu1 %v5554_v50  ;;  %v5562_v47 = vld [vmem:[#allocation59_spill] sm:$0xff]  ;;  %v5563_v50 = vld [vmem:[#allocation60_spill] sm:$0xff] }
 0x400   :  { %1157 = vmatmul.mubr.f32.vlgmr.msra.gmra.mrb[10].mxu0 %v4865_v46  ;;  %1228 = vmatmul.mubr.f32.vlgmr.msra.gmra.mrb[10].mxu1 %v4865_v46 }
 0x401   :  { %3036 = vmatpush3.bf16.msra.mxu0 %v5555_v2  ;;  %3068 = vmatpush3.bf16.msra.mxu1 %v5556_v42  ;;  %v5566_v2 = vld [vmem:[#allocation63_spill] sm:$0xff]  ;;  %v5567_v42 = vld [vmem:[#allocation64_spill] sm:$0xff] }
 0x402   :  { %3038 = vmatprep.subr.bf16.mxu0 %v5557_v34  ;;  %3070 = vmatprep.subr.bf16.mxu1 %v5558_v19  ;;  %v5568_v34 = vld [vmem:[#allocation65_spill] sm:$0xff]  ;;  %v5569_v19 = vld [vmem:[#allocation66_spill] sm:$0xff] }
 0x405   :  { %3040 = vmatpush3.bf16.msra.mxu0 %v5559_v1  ;;  %3072 = vmatpush3.bf16.msra.mxu1 %v5560_v16  ;;  %v5570_v1 = vld [vmem:[#allocation67_spill] sm:$0xff]  ;;  %v5571_v16 = vld [vmem:[#allocation68_spill] sm:$0xff] }
 0x406   :  { %3042 = vmatprep.subr.bf16.mxu0 %v5561_v10  ;;  %3074 = vmatprep.subr.bf16.mxu1 %v5562_v47  ;;  %v5572_v10 = vld [vmem:[#allocation69_spill] sm:$0xff]  ;;  %v5573_v47 = vld [vmem:[#allocation70_spill] sm:$0xff] }
 0x409   :  { %3044 = vmatpush3.bf16.msra.mxu0 %v5563_v50  ;;  %3076 = vmatpush3.bf16.msra.mxu1 %v5564_v60  ;;  %v5574_v50 = vld [vmem:[#allocation71_spill] sm:$0xff]  ;;  %v5575_v60 = vld [vmem:[#allocation72_spill] sm:$0xff] }
 0x40a   :  { %3046 = vmatprep.subr.bf16.mxu0 %v5565_v54  ;;  %3078 = vmatprep.subr.bf16.mxu1 %v5566_v2  ;;  %v5576_v54 = vld [vmem:[#allocation73_spill] sm:$0xff]  ;;  %v5577_v2 = vld [vmem:[#allocation74_spill] sm:$0xff] }
 0x40d   :  { %3048 = vmatpush3.bf16.msra.mxu0 %v5567_v42  ;;  %3080 = vmatpush3.bf16.msra.mxu1 %v5568_v34  ;;  %v5578_v42 = vld [vmem:[#allocation75_spill] sm:$0xff]  ;;  %v5579_v34 = vld [vmem:[#allocation76_spill] sm:$0xff] }
 0x40e   :  { %3050 = vmatprep.subr.bf16.mxu0 %v5569_v19  ;;  %3082 = vmatprep.subr.bf16.mxu1 %v5570_v1  ;;  %v5580_v19 = vld [vmem:[#allocation77_spill] sm:$0xff]  ;;  %v5581_v1 = vld [vmem:[#allocation78_spill] sm:$0xff] }
 0x411   :  { %3052 = vmatpush3.bf16.msra.mxu0 %v5571_v16  ;;  %3084 = vmatpush3.bf16.msra.mxu1 %v5572_v10  ;;  %v5582_v16 = vld [vmem:[#allocation79_spill] sm:$0xff]  ;;  %v5583_v10 = vld [vmem:[#allocation80_spill] sm:$0xff] }
 0x412   :  { %3054 = vmatprep.subr.bf16.mxu0 %v5573_v47  ;;  %3086 = vmatprep.subr.bf16.mxu1 %v5574_v50  ;;  %v5584_v47 = vld [vmem:[#allocation81_spill] sm:$0xff]  ;;  %v5585_v50 = vld [vmem:[#allocation82_spill] sm:$0xff] }
 0x415   :  { %3056 = vmatpush3.bf16.msra.mxu0 %v5575_v60  ;;  %3088 = vmatpush3.bf16.msra.mxu1 %v5576_v54  ;;  %v5586_v60 = vld [vmem:[#allocation83_spill] sm:$0xff] }
 0x416   :  { %3058 = vmatprep.subr.bf16.mxu0 %v5577_v2  ;;  %3090 = vmatprep.subr.bf16.mxu1 %v5578_v42 }
 0x419   :  { %3060 = vmatpush3.bf16.msra.mxu0 %v5579_v34  ;;  %3092 = vmatpush3.bf16.msra.mxu1 %v5580_v19 }
 0x41a   :  { %3062 = vmatprep.subr.bf16.mxu0 %v5581_v1  ;;  %3094 = vmatprep.subr.bf16.mxu1 %v5582_v16 }
 0x41d   :  { %3064 = vmatpush3.bf16.msra.mxu0 %v5583_v10  ;;  %3096 = vmatpush3.bf16.msra.mxu1 %v5584_v47  ;;  %v5606_v10 = vld [vmem:[#allocation103_spill] sm:$0xff] }
 0x41e   :  { %3098 = vmatprep.subr.bf16.mxu0 %v5585_v50  ;;  %3130 = vmatprep.subr.bf16.mxu1 %v5586_v60 }
 0x4b3   :  { %v1016_v54 = vpop.f32.mrb[8].mxu0  ;;  %v1087_v2 = vpop.f32.mrb[8].mxu1 }
 0x4b4   :  { %v1017_v42 = vadd.f32 %v1016_v54, %v5587_v6  ;;  %v1018_v20 = vpop.f32.mrb[9].mxu0  ;;  %v1089_v34 = vpop.f32.mrb[9].mxu1  ;;  %v1088_v16 = vadd.f32 %v1087_v2, %v5590_v37  ;;  %v5596_v2 = vld [vmem:[#allocation93_spill] sm:$0xff]  ;;  %v5598_v37 = vld [vmem:[#allocation95_spill] sm:$0xff]  ;;  %v5601_v6 = vld [vmem:[#allocation98_spill] sm:$0xff] }
 0x4b5   :  { %v1019_v19 = vadd.f32 %v1018_v20, %v5588_v55  ;;  %v1090_v1 = vadd.f32 %v1089_v34, %v5589_v43  ;;  %v5591_v34 = vld [vmem:[#allocation88_spill] sm:$0xff]  ;;  %v5593_v20 = vld [vmem:[#allocation90_spill] sm:$0xff]  ;;  %v5600_v55 = vld [vmem:[#allocation97_spill] sm:$0xff] }
 0x4b6   :  { %3471 = vtanh.f32 %v1017_v42  ;;  %v5597_v42 = vld [vmem:[#allocation94_spill] sm:$0xff]  ;;  %v5599_v43 = vld [vmem:[#allocation96_spill] sm:$0xff] }
 0x4b7   :  { %3473 = vtanh.f32 %v1019_v19  ;;  %v5592_v19 = vld [vmem:[#allocation89_spill] sm:$0xff] }
 0x4b8   :  { %3475 = vtanh.f32 %v1090_v1  ;;  %v5594_v1 = vld [vmem:[#allocation91_spill] sm:$0xff] }
 0x4b9   :  { %3477 = vtanh.f32 %v1088_v16  ;;  %v5595_v16 = vld [vmem:[#allocation92_spill] sm:$0xff] }
 0x4c0   :  { %v4941_v47 = vpop.eup %3471 }
 0x4c1   :  { %v4943_v50 = vpop.eup %3473 }
 0x4c2   :  { %v4945_v60 = vpop.eup %3475  ;;  %1306 = vmatprep.mubr.f32.mxu0 %v4943_v50 }
 0x4c3   :  { %v4948_v54 = vpop.eup %3477  ;;  %1376 = vmatprep.mubr.f32.mxu1 %v4945_v60  ;;  %1307 = vmatmul.mubr.f32.vlgmr.msra.gmra.mrb[12].mxu0 %v4941_v47 }
 0x4c4   :  { %1377 = vmatmul.mubr.f32.vlgmr.msra.gmra.mrb[12].mxu1 %v4948_v54  ;;  %3100 = vmatpush3.bf16.msra.mxu0 %v5591_v34  ;;  %v5602_v34 = vld [vmem:[#allocation99_spill] sm:$0xff] }
 0x4c5   :  { %3132 = vmatpush3.bf16.msra.mxu1 %v5592_v19  ;;  %3102 = vmatprep.subr.bf16.mxu0 %v5593_v20  ;;  %v5603_v19 = vld [vmem:[#allocation100_spill] sm:$0xff]  ;;  %v5604_v20 = vld [vmem:[#allocation101_spill] sm:$0xff] }
 0x4c6   :  { %3134 = vmatprep.subr.bf16.mxu1 %v5594_v1  ;;  %v5605_v1 = vld [vmem:[#allocation102_spill] sm:$0xff] }
 0x4c8   :  { %3104 = vmatpush3.bf16.msra.mxu0 %v5595_v16 }
 0x4c9   :  { %3136 = vmatpush3.bf16.msra.mxu1 %v5596_v2  ;;  %3106 = vmatprep.subr.bf16.mxu0 %v5597_v42  ;;  %v5607_v42 = vld [vmem:[#allocation104_spill] sm:$0xff] }
 0x4ca   :  { %3138 = vmatprep.subr.bf16.mxu1 %v5598_v37 }
 0x4cc   :  { %3108 = vmatpush3.bf16.msra.mxu0 %v5599_v43 }
 0x4cd   :  { %3140 = vmatpush3.bf16.msra.mxu1 %v5600_v55  ;;  %3110 = vmatprep.subr.bf16.mxu0 %v5601_v6 }
 0x4ce   :  { %3142 = vmatprep.subr.bf16.mxu1 %v5602_v34 }
 0x4d0   :  { %3112 = vmatpush3.bf16.msra.mxu0 %v5603_v19 }
 0x4d1   :  { %3144 = vmatpush3.bf16.msra.mxu1 %v5604_v20  ;;  %3114 = vmatprep.subr.bf16.mxu0 %v5605_v1 }
 0x4d2   :  { %3146 = vmatprep.subr.bf16.mxu1 %v5606_v10 }
 0x4d3   :  { %v1158_v16 = vpop.f32.mrb[10].mxu0  ;;  %v1229_v2 = vpop.f32.mrb[10].mxu1 }
 0x4d4   :  { %v1159_v37 = vadd.f32 %v1158_v16, %v5607_v42  ;;  %v1160_v36 = vpop.f32.mrb[11].mxu0  ;;  %v1231_v43 = vpop.f32.mrb[11].mxu1  ;;  %3116 = vmatpush3.bf16.msra.mxu0 %v4683_v28  ;;  %v1230_v19 = vadd.f32 %v1229_v2, %v4678_v62 }
 0x4d5   :  { %v1161_v55 = vadd.f32 %v1160_v36, %v4681_v45  ;;  %v1232_v6 = vadd.f32 %v1231_v43, %v4688_v21  ;;  %3148 = vmatpush3.bf16.msra.mxu1 %v4690_v38  ;;  %3118 = vmatprep.subr.bf16.mxu0 %v4692_v24 }
 0x4d6   :  { %3479 = vtanh.f32 %v1159_v37  ;;  %3150 = vmatprep.subr.bf16.mxu1 %v4704_v41 }
 0x4d7   :  { %3481 = vtanh.f32 %v1161_v55 }
 0x4d8   :  { %3483 = vtanh.f32 %v1232_v6  ;;  %3120 = vmatpush3.bf16.msra.mxu0 %v4725_v14 }
 0x4d9   :  { %3485 = vtanh.f32 %v1230_v19  ;;  %3152 = vmatpush3.bf16.msra.mxu1 %v4730_v15  ;;  %3122 = vmatprep.subr.bf16.mxu0 %v4732_v12 }
 0x4da   :  { %3154 = vmatprep.subr.bf16.mxu1 %v4744_v4 }
 0x4dc   :  { %3124 = vmatpush3.bf16.msra.mxu0 %v4762_v5 }
 0x4dd   :  { %3156 = vmatpush3.bf16.msra.mxu1 %v4766_v23  ;;  %3126 = vmatprep.subr.bf16.mxu0 %v4768_v33 }
 0x4de   :  { %3158 = vmatprep.subr.bf16.mxu1 %v4777_v30 }
 0x4e0   :  { %v4985_v36 = vpop.eup %3479  ;;  %3128 = vmatpush3.bf16.msra.mxu0 %v4786_v32 }
 0x4e1   :  { %v4988_v37 = vpop.eup %3481  ;;  %3160 = vmatpush3.bf16.msra.mxu1 %v4790_v56  ;;  %3162 = vmatprep.subr.bf16.mxu0 %v3580_v3  ;;  %v5608_v3 = vld [vmem:[#allocation5_spill] sm:$0xff] }
 0x4e2   :  { %v4992_v43 = vpop.eup %3483  ;;  %1446 = vmatprep.mubr.f32.mxu0 %v4988_v37  ;;  %3194 = vmatprep.subr.bf16.mxu1 %v3593_v8  ;;  %v5609_v8 = vld [vmem:[#allocation6_spill] sm:$0xff] }
 0x4e3   :  { %v4996_v55 = vpop.eup %3485  ;;  %1516 = vmatprep.mubr.f32.mxu1 %v4992_v43  ;;  %1447 = vmatmul.mubr.f32.vlgmr.msra.gmra.mrb[14].mxu0 %v4985_v36 }
 0x4e4   :  { %1517 = vmatmul.mubr.f32.vlgmr.msra.gmra.mrb[14].mxu1 %v4996_v55  ;;  %3164 = vmatpush1.bf16.msra.mxu0 %v3595_v9  ;;  %v5610_v9 = vld [vmem:[#allocation7_spill] sm:$0xff] }
 0x4e5   :  { %3196 = vmatpush1.bf16.msra.mxu1 %v3607_v13  ;;  %3166 = vmatprep.subr.bf16.mxu0 %v3620_v17  ;;  %v5611_v13 = vld [vmem:[#allocation8_spill] sm:$0xff]  ;;  %v5612_v17 = vld [vmem:[#allocation9_spill] sm:$0xff] }
 0x4e6   :  { %3198 = vmatprep.subr.bf16.mxu1 %v3622_v18  ;;  %1646 = vmatprep.mubr.f32.mxu0 %v5523_v58  ;;  %v5613_v18 = vld [vmem:[#allocation10_spill] sm:$0xff] }
 0x4e7   :  { %1717 = vmatprep.mubr.f32.mxu1 %v5523_v58 }
 0x4e8   :  { %3168 = vmatpush1.bf16.msra.mxu0 %v3634_v22  ;;  %v5614_v22 = vld [vmem:[#allocation11_spill] sm:$0xff] }
 0x4e9   :  { %3200 = vmatpush1.bf16.msra.mxu1 %v3647_v26  ;;  %3170 = vmatprep.subr.bf16.mxu0 %v3649_v27  ;;  %v5615_v26 = vld [vmem:[#allocation12_spill] sm:$0xff]  ;;  %v5616_v27 = vld [vmem:[#allocation13_spill] sm:$0xff] }
 0x4ea   :  { %3202 = vmatprep.subr.bf16.mxu1 %v3660_v31  ;;  %v5617_v31 = vld [vmem:[#allocation14_spill] sm:$0xff] }
 0x4ec   :  { %3172 = vmatpush1.bf16.msra.mxu0 %v3672_v35  ;;  %v5618_v35 = vld [vmem:[#allocation15_spill] sm:$0xff] }
 0x4ed   :  { %3204 = vmatpush1.bf16.msra.mxu1 %v3685_v39  ;;  %3174 = vmatprep.subr.bf16.mxu0 %v3687_v40  ;;  %v5619_v39 = vld [vmem:[#allocation16_spill] sm:$0xff]  ;;  %v5620_v40 = vld [vmem:[#allocation17_spill] sm:$0xff] }
 0x4ee   :  { %3206 = vmatprep.subr.bf16.mxu1 %v3699_v44  ;;  %v5621_v44 = vld [vmem:[#allocation18_spill] sm:$0xff] }
 0x4f0   :  { %3176 = vmatpush1.bf16.msra.mxu0 %v3720_v51  ;;  %v5622_v51 = vld [vmem:[#allocation19_spill] sm:$0xff] }
 0x4f1   :  { %3208 = vmatpush1.bf16.msra.mxu1 %v3724_v52  ;;  %3178 = vmatprep.subr.bf16.mxu0 %v3726_v53  ;;  %v5623_v52 = vld [vmem:[#allocation20_spill] sm:$0xff] }
 0x4f2   :  { %3210 = vmatprep.subr.bf16.mxu1 %v3738_v57 }
 0x4f4   :  { %3180 = vmatpush1.bf16.msra.mxu0 %v5608_v3 }
 0x4f5   :  { %3212 = vmatpush1.bf16.msra.mxu1 %v5609_v8  ;;  %3182 = vmatprep.subr.bf16.mxu0 %v5610_v9 }
 0x4f6   :  { %3214 = vmatprep.subr.bf16.mxu1 %v5611_v13 }
 0x4f8   :  { %3184 = vmatpush1.bf16.msra.mxu0 %v5612_v17 }
 0x4f9   :  { %3216 = vmatpush1.bf16.msra.mxu1 %v5613_v18  ;;  %3186 = vmatprep.subr.bf16.mxu0 %v5614_v22 }
 0x4fa   :  { %3218 = vmatprep.subr.bf16.mxu1 %v5615_v26 }
 0x4fc   :  { %3188 = vmatpush1.bf16.msra.mxu0 %v5616_v27 }
 0x4fd   :  { %3220 = vmatpush1.bf16.msra.mxu1 %v5617_v31  ;;  %3190 = vmatprep.subr.bf16.mxu0 %v5618_v35 }
 0x4fe   :  { %3222 = vmatprep.subr.bf16.mxu1 %v5619_v39 }
 0x500   :  { %3192 = vmatpush1.bf16.msra.mxu0 %v5620_v40 }
 0x501   :  { %3224 = vmatpush1.bf16.msra.mxu1 %v5621_v44  ;;  %3226 = vmatprep.subr.bf16.mxu0 %v5622_v51 }
 0x502   :  { %3258 = vmatprep.subr.bf16.mxu1 %v5623_v52 }
 0x596   :  { %v2401_v53 = vpop.f32.mrb[12].mxu0 }
 0x597   :  { %v2436_v57 = vpop.f32.mrb[12].mxu1  ;;  %v2402_v6 = vpop.f32.mrb[13].mxu0 }
 0x598   :  { %v2403_v19 = vadd.f32 %v2402_v6, %v2401_v53  ;;  %v2437_v16 = vpop.f32.mrb[13].mxu1  ;;  %v5624_v6 = vmov 1  }
 0x599   :  { %v2438_v2 = vadd.f32 %v2437_v16, %v2436_v57  ;;  %v5626_v16 = vmov 3  }
 0x59b   :  { %v1379_v3 = vadd.f32 %v2438_v2, %v2403_v19  ;;  %v5625_v19 = vmov 0   ;;  %v5627_v2 = vmov 4  }
 0x5b6   :  { %v2471_v8 = vpop.f32.mrb[14].mxu0 }
 0x5b7   :  { %v2506_v9 = vpop.f32.mrb[14].mxu1  ;;  %v2472_v13 = vpop.f32.mrb[15].mxu0 }
 0x5b8   :  { %v2473_v17 = vadd.f32 %v2472_v13, %v2471_v8  ;;  %v2507_v18 = vpop.f32.mrb[15].mxu1  ;;  %v5629_v8 = vmov 6  }
 0x5b9   :  { %v2508_v22 = vadd.f32 %v2507_v18, %v2506_v9  ;;  %v5630_v9 = vmov 7  }
 0x5ba   :  { %v1449_v26 = vadd.f32 %v2473_v17, %v1379_v3  ;;  %v5628_v3 = vmov 5  }
 0x5bc   :  { %v1519_v27 = vadd.f32 %v2508_v22, %v1449_v26 }
 0x5be   :  { %v1522_v31 = vsel %vm889_vm0, %v1519_v27, -inf }
 0x5bf   :  { %1523 = vmax.xlane.f32.xlu1 %v1522_v31 }
 0x64c   :  { %v1524_v35 = vpop.xlane.xlu1 %1523 }
 0x64d   :  { %v1525_v39 = vsub.f32 %v1519_v27, %v1524_v35 }
 0x64f   :  { %v1526_v40 = vmul.f32 1.442695, %v1525_v39 }
 0x651   :  { %3487 = vpow2.f32 %v1526_v40 }
 0x65b   :  { %v3488_v44 = vpop.eup %3487 }
 0x65c   :  { %v1528_v51 = vsel %vm889_vm0, %v3488_v44, 0.0 }
 0x65d   :  { %1529 = vadd.xlane.f32.xlu0 %v1528_v51 }
 0x6ea   :  { %v1530_v52 = vpop.xlane.xlu0 %1529 }
 0x6eb   :  { %3489 = vrcp.f32 %v1530_v52 }
 0x6f5   :  { %v3490_v53 = vpop.eup %3489 }
 0x6f6   :  { %v1532_v57 = vmul.f32 %v3490_v53, %v3488_v44 }
 0x6f8   :  { %1547 = vperm.xlu0 %3429, %v1532_v57   ;;  %1535 = vperm.xlu1 %3435, %v1532_v57  }
 0x6fc   :  { %3436 = vset.pattern.permute.xlu1 %v5624_v6  ;;  %3442 = vset.pattern.permute.xlu0 %v5625_v19 }
 0x6fd   :  { %1541 = vperm.xlu1 %3436, %v1532_v57  }
 0x701   :  { %3437 = vset.pattern.permute.xlu1 %v5626_v16 }
 0x702   :  { %1553 = vperm.xlu1 %3437, %v1532_v57  }
 0x706   :  { %3438 = vset.pattern.permute.xlu1 %v5627_v2 }
 0x707   :  { %1559 = vperm.xlu1 %3438, %v1532_v57  }
 0x70b   :  { %3439 = vset.pattern.permute.xlu1 %v5628_v3 }
 0x70c   :  { %1565 = vperm.xlu1 %3439, %v1532_v57  }
 0x710   :  { %3440 = vset.pattern.permute.xlu1 %v5629_v8 }
 0x711   :  { %1571 = vperm.xlu1 %3440, %v1532_v57  }
 0x715   :  { %3441 = vset.pattern.permute.xlu1 %v5630_v9 }
 0x716   :  { %1577 = vperm.xlu1 %3441, %v1532_v57  }
 0x71a   :  { %3443 = vset.pattern.permute.xlu1 %v5624_v6 }
 0x777   :  { %v1536_v13 = vpop.permute.xlu1 %1535  ;;  %v1548_v35 = vpop.permute.xlu0 %1547 }
 0x778   :  { %v1538_v22 = vmul.f32 %v4941_v47, %v1536_v13  ;;  %v1550_v40 = vmul.f32 %v4948_v54, %v1548_v35  ;;  %v5643_v54 = vld [vmem:[#allocation42_spill] sm:$0xff] }
 0x779   :  { %v5651_v35 = vld [vmem:[#allocation50_spill] sm:$0xff] }
 0x77a   :  { %v1539_v27 = vadd.f32 %v1538_v22, %v4865_v46 }
 0x77c   :  { %v1542_v17 = vpop.permute.xlu1 %1541 }
 0x77d   :  { %v1544_v26 = vmul.f32 %v4943_v50, %v1542_v17 }
 0x77f   :  { %v1545_v39 = vadd.f32 %v1544_v26, %v1539_v27  ;;  %v5649_v27 = vld [vmem:[#allocation48_spill] sm:$0xff] }
 0x781   :  { %v1554_v18 = vpop.permute.xlu1 %1553  ;;  %v1551_v51 = vadd.f32 %v1550_v40, %v1545_v39  ;;  %v5652_v39 = vld [vmem:[#allocation51_spill] sm:$0xff]  ;;  %v5653_v40 = vld [vmem:[#allocation52_spill] sm:$0xff] }
 0x782   :  { %v1556_v52 = vmul.f32 %v4945_v60, %v1554_v18  ;;  %v5642_v60 = vld [vmem:[#allocation41_spill] sm:$0xff]  ;;  %v5648_v18 = vld [vmem:[#allocation47_spill] sm:$0xff] }
 0x784   :  { %v1557_v57 = vadd.f32 %v1556_v52, %v1551_v51  ;;  %v5655_v51 = vld [vmem:[#allocation54_spill] sm:$0xff]  ;;  %v5656_v52 = vld [vmem:[#allocation55_spill] sm:$0xff] }
 0x786   :  { %v1560_v31 = vpop.permute.xlu1 %1559 }
 0x787   :  { %v1562_v53 = vmul.f32 %v4985_v36, %v1560_v31  ;;  %v5644_v36 = vld [vmem:[#allocation43_spill] sm:$0xff]  ;;  %v5650_v31 = vld [vmem:[#allocation49_spill] sm:$0xff] }
 0x789   :  { %v1563_v47 = vadd.f32 %v1562_v53, %v1557_v57  ;;  %v5657_v53 = vld [vmem:[#allocation56_spill] sm:$0xff]  ;;  %v5658_v57 = vld [vmem:[#allocation57_spill] sm:$0xff] }
 0x78b   :  { %v1566_v44 = vpop.permute.xlu1 %1565 }
 0x78c   :  { %v1568_v6 = vmul.f32 %v4988_v37, %v1566_v44  ;;  %v5645_v37 = vld [vmem:[#allocation44_spill] sm:$0xff]  ;;  %v5654_v44 = vld [vmem:[#allocation53_spill] sm:$0xff] }
 0x78e   :  { %v1569_v13 = vadd.f32 %v1568_v6, %v1563_v47  ;;  %v5659_v6 = vld [vmem:[#allocation58_spill] sm:$0xff]  ;;  %v5661_v47 = vld [vmem:[#allocation60_spill] sm:$0xff] }
 0x790   :  { %v1572_v19 = vpop.permute.xlu1 %1571 }
 0x791   :  { %v1574_v50 = vmul.f32 %v4996_v55, %v1572_v19  ;;  %v5647_v55 = vld [vmem:[#allocation46_spill] sm:$0xff]  ;;  %v5660_v19 = vld [vmem:[#allocation59_spill] sm:$0xff] }
 0x793   :  { %v1575_v17 = vadd.f32 %v1574_v50, %v1569_v13  ;;  %v5662_v50 = vld [vmem:[#allocation61_spill] sm:$0xff]  ;;  %v5663_v13 = vld [vmem:[#allocation62_spill] sm:$0xff] }
 0x795   :  { %v1578_v46 = vpop.permute.xlu1 %1577 }
 0x796   :  { %v1580_v22 = vmul.f32 %v4992_v43, %v1578_v46  ;;  %v5646_v43 = vld [vmem:[#allocation45_spill] sm:$0xff]  ;;  %v5664_v46 = vld [vmem:[#allocation63_spill] sm:$0xff] }
 0x798   :  { %v5054_v26 = vadd.f32 %v1580_v22, %v1575_v17  ;;  %v5665_v17 = vld [vmem:[#allocation64_spill] sm:$0xff]  ;;  %v5666_v22 = vld [vmem:[#allocation65_spill] sm:$0xff] }
 0x79a   :  { %1647 = vmatmul.mubr.f32.vlgmr.msra.gmra.mrb[16].mxu0 %v5054_v26  ;;  %1718 = vmatmul.mubr.f32.vlgmr.msra.gmra.mrb[16].mxu1 %v5054_v26 }
 0x79b   :  { %3228 = vmatpush1.bf16.msra.mxu0 %v3905_v11  ;;  %3260 = vmatpush1.bf16.msra.mxu1 %v5524_v7  ;;  %v5631_v11 = vld [vmem:[#allocation30_spill] sm:$0xff]  ;;  %v5632_v7 = vld [vmem:[#allocation31_spill] sm:$0xff] }
 0x79c   :  { %3230 = vmatprep.subr.bf16.mxu0 %v5525_v29  ;;  %3262 = vmatprep.subr.bf16.mxu1 %v5526_v59  ;;  %v5633_v29 = vld [vmem:[#allocation32_spill] sm:$0xff]  ;;  %v5634_v59 = vld [vmem:[#allocation33_spill] sm:$0xff] }
 0x79d   :  { %1788 = vmatprep.mubr.f32.mxu0 %v5523_v58  ;;  %1859 = vmatprep.mubr.f32.mxu1 %v5523_v58  ;;  %v5635_v58 = vld [vmem:[#allocation34_spill] sm:$0xff] }
 0x79f   :  { %3232 = vmatpush1.bf16.msra.mxu0 %v5527_v49  ;;  %3264 = vmatpush1.bf16.msra.mxu1 %v5528_v48  ;;  %v5636_v49 = vld [vmem:[#allocation35_spill] sm:$0xff]  ;;  %v5637_v48 = vld [vmem:[#allocation36_spill] sm:$0xff] }
 0x7a0   :  { %3234 = vmatprep.subr.bf16.mxu0 %v5529_v61  ;;  %3266 = vmatprep.subr.bf16.mxu1 %v5530_v25  ;;  %v5638_v61 = vld [vmem:[#allocation37_spill] sm:$0xff]  ;;  %v5639_v25 = vld [vmem:[#allocation38_spill] sm:$0xff] }
 0x7a3   :  { %3236 = vmatpush1.bf16.msra.mxu0 %v5531_v63  ;;  %3268 = vmatpush1.bf16.msra.mxu1 %v5532_v0  ;;  %v5640_v63 = vld [vmem:[#allocation39_spill] sm:$0xff]  ;;  %v5641_v0 = vld [vmem:[#allocation40_spill] sm:$0xff] }
 0x7a4   :  { %3238 = vmatprep.subr.bf16.mxu0 %v5631_v11  ;;  %3270 = vmatprep.subr.bf16.mxu1 %v5632_v7  ;;  %v5667_v11 = vld [vmem:[#allocation66_spill] sm:$0xff]  ;;  %v5668_v7 = vld [vmem:[#allocation67_spill] sm:$0xff] }
 0x7a7   :  { %3240 = vmatpush1.bf16.msra.mxu0 %v5633_v29  ;;  %3272 = vmatpush1.bf16.msra.mxu1 %v5634_v59  ;;  %v5669_v29 = vld [vmem:[#allocation68_spill] sm:$0xff]  ;;  %v5670_v59 = vld [vmem:[#allocation69_spill] sm:$0xff] }
 0x7a8   :  { %3242 = vmatprep.subr.bf16.mxu0 %v5635_v58  ;;  %3274 = vmatprep.subr.bf16.mxu1 %v5636_v49  ;;  %v5671_v58 = vld [vmem:[#allocation70_spill] sm:$0xff]  ;;  %v5672_v49 = vld [vmem:[#allocation71_spill] sm:$0xff] }
 0x7ab   :  { %3244 = vmatpush1.bf16.msra.mxu0 %v5637_v48  ;;  %3276 = vmatpush1.bf16.msra.mxu1 %v5638_v61  ;;  %v5673_v48 = vld [vmem:[#allocation72_spill] sm:$0xff]  ;;  %v5674_v61 = vld [vmem:[#allocation73_spill] sm:$0xff] }
 0x7ac   :  { %3246 = vmatprep.subr.bf16.mxu0 %v5639_v25  ;;  %3278 = vmatprep.subr.bf16.mxu1 %v5640_v63  ;;  %v5675_v25 = vld [vmem:[#allocation74_spill] sm:$0xff]  ;;  %v5676_v63 = vld [vmem:[#allocation75_spill] sm:$0xff] }
 0x7af   :  { %3248 = vmatpush1.bf16.msra.mxu0 %v5641_v0  ;;  %3280 = vmatpush1.bf16.msra.mxu1 %v5642_v60  ;;  %v5677_v0 = vld [vmem:[#allocation76_spill] sm:$0xff]  ;;  %v5678_v60 = vld [vmem:[#allocation77_spill] sm:$0xff] }
 0x7b0   :  { %3250 = vmatprep.subr.bf16.mxu0 %v5643_v54  ;;  %3282 = vmatprep.subr.bf16.mxu1 %v5644_v36  ;;  %v5679_v54 = vld [vmem:[#allocation78_spill] sm:$0xff]  ;;  %v5680_v36 = vld [vmem:[#allocation79_spill] sm:$0xff] }
 0x7b3   :  { %3252 = vmatpush1.bf16.msra.mxu0 %v5645_v37  ;;  %3284 = vmatpush1.bf16.msra.mxu1 %v5646_v43  ;;  %v5681_v37 = vld [vmem:[#allocation80_spill] sm:$0xff]  ;;  %v5682_v43 = vld [vmem:[#allocation81_spill] sm:$0xff] }
 0x7b4   :  { %3254 = vmatprep.subr.bf16.mxu0 %v5647_v55  ;;  %3286 = vmatprep.subr.bf16.mxu1 %v5648_v18  ;;  %v5683_v55 = vld [vmem:[#allocation82_spill] sm:$0xff]  ;;  %v5684_v18 = vld [vmem:[#allocation83_spill] sm:$0xff] }
 0x7b7   :  { %3256 = vmatpush1.bf16.msra.mxu0 %v5649_v27  ;;  %3288 = vmatpush1.bf16.msra.mxu1 %v5650_v31 }
 0x7b8   :  { %3290 = vmatprep.subr.bf16.mxu0 %v5651_v35  ;;  %3322 = vmatprep.subr.bf16.mxu1 %v5652_v39  ;;  %v5685_v35 = vld [vmem:[#allocation84_spill] sm:$0xff] }
 0x7ba   :  { %1789 = vmatmul.mubr.f32.vlgmr.msra.gmra.mrb[18].mxu0 %v5054_v26  ;;  %1860 = vmatmul.mubr.f32.vlgmr.msra.gmra.mrb[18].mxu1 %v5054_v26 }
 0x7bb   :  { %3292 = vmatpush3.bf16.msra.mxu0 %v5653_v40  ;;  %3324 = vmatpush3.bf16.msra.mxu1 %v5654_v44 }
 0x7bc   :  { %3294 = vmatprep.subr.bf16.mxu0 %v5655_v51  ;;  %3326 = vmatprep.subr.bf16.mxu1 %v5656_v52  ;;  %v5686_v51 = vld [vmem:[#allocation86_spill] sm:$0xff] }
 0x7bf   :  { %3296 = vmatpush3.bf16.msra.mxu0 %v5657_v53  ;;  %3328 = vmatpush3.bf16.msra.mxu1 %v5658_v57  ;;  %v5687_v53 = vld [vmem:[#allocation87_spill] sm:$0xff] }
 0x7c0   :  { %3298 = vmatprep.subr.bf16.mxu0 %v5659_v6  ;;  %3330 = vmatprep.subr.bf16.mxu1 %v5660_v19  ;;  %v5688_v6 = vld [vmem:[#allocation85_spill] sm:$0xff] }
 0x7c3   :  { %3300 = vmatpush3.bf16.msra.mxu0 %v5661_v47  ;;  %3332 = vmatpush3.bf16.msra.mxu1 %v5662_v50 }
 0x7c4   :  { %3302 = vmatprep.subr.bf16.mxu0 %v5663_v13  ;;  %3334 = vmatprep.subr.bf16.mxu1 %v5664_v46 }
 0x7c7   :  { %3304 = vmatpush3.bf16.msra.mxu0 %v5665_v17  ;;  %3336 = vmatpush3.bf16.msra.mxu1 %v5666_v22  ;;  %v5689_v17 = vld [vmem:[#allocation88_spill] sm:$0xff]  ;;  %v5690_v22 = vld [vmem:[#allocation89_spill] sm:$0xff] }
 0x7c8   :  { %3306 = vmatprep.subr.bf16.mxu0 %v5667_v11  ;;  %3338 = vmatprep.subr.bf16.mxu1 %v5668_v7  ;;  %v5691_v11 = vld [vmem:[#allocation90_spill] sm:$0xff]  ;;  %v5692_v7 = vld [vmem:[#allocation91_spill] sm:$0xff] }
 0x7cb   :  { %3308 = vmatpush3.bf16.msra.mxu0 %v5669_v29  ;;  %3340 = vmatpush3.bf16.msra.mxu1 %v5670_v59  ;;  %v5693_v29 = vld [vmem:[#allocation92_spill] sm:$0xff]  ;;  %v5694_v59 = vld [vmem:[#allocation93_spill] sm:$0xff] }
 0x7cc   :  { %3310 = vmatprep.subr.bf16.mxu0 %v5671_v58  ;;  %3342 = vmatprep.subr.bf16.mxu1 %v5672_v49  ;;  %v5695_v58 = vld [vmem:[#allocation94_spill] sm:$0xff]  ;;  %v5696_v49 = vld [vmem:[#allocation95_spill] sm:$0xff] }
 0x7cf   :  { %3312 = vmatpush3.bf16.msra.mxu0 %v5673_v48  ;;  %3344 = vmatpush3.bf16.msra.mxu1 %v5674_v61  ;;  %v5697_v48 = vld [vmem:[#allocation96_spill] sm:$0xff]  ;;  %v5698_v61 = vld [vmem:[#allocation97_spill] sm:$0xff] }
 0x7d0   :  { %3314 = vmatprep.subr.bf16.mxu0 %v5675_v25  ;;  %3346 = vmatprep.subr.bf16.mxu1 %v5676_v63  ;;  %v5699_v25 = vld [vmem:[#allocation98_spill] sm:$0xff]  ;;  %v5700_v63 = vld [vmem:[#allocation100_spill] sm:$0xff] }
 0x7d3   :  { %3316 = vmatpush3.bf16.msra.mxu0 %v5677_v0  ;;  %3348 = vmatpush3.bf16.msra.mxu1 %v5678_v60 }
 0x7d4   :  { %3318 = vmatprep.subr.bf16.mxu0 %v5679_v54  ;;  %3350 = vmatprep.subr.bf16.mxu1 %v5680_v36 }
 0x7d7   :  { %3320 = vmatpush3.bf16.msra.mxu0 %v5681_v37  ;;  %3352 = vmatpush3.bf16.msra.mxu1 %v5682_v43 }
 0x7d8   :  { %3354 = vmatprep.subr.bf16.mxu0 %v5683_v55  ;;  %3386 = vmatprep.subr.bf16.mxu1 %v5684_v18 }
 0x86d   :  { %v1648_v27 = vpop.f32.mrb[16].mxu0  ;;  %v1719_v31 = vpop.f32.mrb[16].mxu1 }
 0x86e   :  { %v1649_v39 = vadd.f32 %v1648_v27, %v5685_v35  ;;  %v1650_v40 = vpop.f32.mrb[17].mxu0  ;;  %v1721_v44 = vpop.f32.mrb[17].mxu1  ;;  %v1720_v19 = vadd.f32 %v1719_v31, %v5688_v6 }
 0x86f   :  { %v1651_v52 = vadd.f32 %v1650_v40, %v5686_v51  ;;  %v1722_v57 = vadd.f32 %v1721_v44, %v5687_v53  ;;  %v5701_v51 = vmov 2  }
 0x870   :  { %3491 = vtanh.f32 %v1649_v39 }
 0x871   :  { %3493 = vtanh.f32 %v1651_v52 }
 0x872   :  { %3495 = vtanh.f32 %v1722_v57 }
 0x873   :  { %3497 = vtanh.f32 %v1720_v19 }
 0x87a   :  { %v5130_v47 = vpop.eup %3491 }
 0x87b   :  { %v5132_v50 = vpop.eup %3493 }
 0x87c   :  { %v5134_v13 = vpop.eup %3495  ;;  %1938 = vmatprep.mubr.f32.mxu0 %v5132_v50 }
 0x87d   :  { %v5137_v46 = vpop.eup %3497  ;;  %2008 = vmatprep.mubr.f32.mxu1 %v5134_v13  ;;  %1939 = vmatmul.mubr.f32.vlgmr.msra.gmra.mrb[20].mxu0 %v5130_v47 }
 0x87e   :  { %2009 = vmatmul.mubr.f32.vlgmr.msra.gmra.mrb[20].mxu1 %v5137_v46  ;;  %3356 = vmatpush3.bf16.msra.mxu0 %v5689_v17 }
 0x87f   :  { %3388 = vmatpush3.bf16.msra.mxu1 %v5690_v22  ;;  %3358 = vmatprep.subr.bf16.mxu0 %v5691_v11 }
 0x880   :  { %3390 = vmatprep.subr.bf16.mxu1 %v5692_v7 }
 0x882   :  { %3360 = vmatpush3.bf16.msra.mxu0 %v5693_v29 }
 0x883   :  { %3392 = vmatpush3.bf16.msra.mxu1 %v5694_v59  ;;  %3362 = vmatprep.subr.bf16.mxu0 %v5695_v58 }
 0x884   :  { %3394 = vmatprep.subr.bf16.mxu1 %v5696_v49 }
 0x886   :  { %3364 = vmatpush3.bf16.msra.mxu0 %v5697_v48 }
 0x887   :  { %3396 = vmatpush3.bf16.msra.mxu1 %v5698_v61  ;;  %3366 = vmatprep.subr.bf16.mxu0 %v5699_v25 }
 0x888   :  { %3398 = vmatprep.subr.bf16.mxu1 %v5602_v34 }
 0x88a   :  { %3368 = vmatpush3.bf16.msra.mxu0 %v5700_v63 }
 0x88b   :  { %3400 = vmatpush3.bf16.msra.mxu1 %v5604_v20  ;;  %3370 = vmatprep.subr.bf16.mxu0 %v5605_v1 }
 0x88c   :  { %3402 = vmatprep.subr.bf16.mxu1 %v5606_v10 }
 0x88d   :  { %v1790_v0 = vpop.f32.mrb[18].mxu0  ;;  %v1861_v60 = vpop.f32.mrb[18].mxu1 }
 0x88e   :  { %v1791_v54 = vadd.f32 %v1790_v0, %v5607_v42  ;;  %v1792_v36 = vpop.f32.mrb[19].mxu0  ;;  %v1863_v37 = vpop.f32.mrb[19].mxu1  ;;  %3372 = vmatpush3.bf16.msra.mxu0 %v4683_v28  ;;  %v1862_v34 = vadd.f32 %v1861_v60, %v4678_v62 }
 0x88f   :  { %v1793_v43 = vadd.f32 %v1792_v36, %v4681_v45  ;;  %v1864_v55 = vadd.f32 %v1863_v37, %v4688_v21  ;;  %3404 = vmatpush3.bf16.msra.mxu1 %v4690_v38  ;;  %3374 = vmatprep.subr.bf16.mxu0 %v4692_v24 }
 0x890   :  { %3499 = vtanh.f32 %v1791_v54  ;;  %3406 = vmatprep.subr.bf16.mxu1 %v4704_v41 }
 0x891   :  { %3501 = vtanh.f32 %v1793_v43 }
 0x892   :  { %3503 = vtanh.f32 %v1864_v55  ;;  %3376 = vmatpush3.bf16.msra.mxu0 %v4725_v14 }
 0x893   :  { %3505 = vtanh.f32 %v1862_v34  ;;  %3408 = vmatpush3.bf16.msra.mxu1 %v4730_v15  ;;  %3378 = vmatprep.subr.bf16.mxu0 %v4732_v12 }
 0x894   :  { %3410 = vmatprep.subr.bf16.mxu1 %v4744_v4 }
 0x896   :  { %3380 = vmatpush3.bf16.msra.mxu0 %v4762_v5 }
 0x897   :  { %3412 = vmatpush3.bf16.msra.mxu1 %v4766_v23  ;;  %3382 = vmatprep.subr.bf16.mxu0 %v4768_v33 }
 0x898   :  { %3414 = vmatprep.subr.bf16.mxu1 %v4777_v30 }
 0x89a   :  { %v5174_v24 = vpop.eup %3499  ;;  %3384 = vmatpush3.bf16.msra.mxu0 %v4786_v32 }
 0x89b   :  { %v5177_v14 = vpop.eup %3501  ;;  %3416 = vmatpush3.bf16.msra.mxu1 %v4790_v56 }
 0x89c   :  { %v5180_v38 = vpop.eup %3503  ;;  %2078 = vmatprep.mubr.f32.mxu0 %v5177_v14 }
 0x89d   :  { %v5183_v12 = vpop.eup %3505  ;;  %2148 = vmatprep.mubr.f32.mxu1 %v5180_v38  ;;  %2079 = vmatmul.mubr.f32.vlgmr.msra.gmra.mrb[22].mxu0 %v5174_v24 }
 0x89e   :  { %2149 = vmatmul.mubr.f32.vlgmr.msra.gmra.mrb[22].mxu1 %v5183_v12 }
 0x950   :  { %v2541_v45 = vpop.f32.mrb[20].mxu0 }
 0x951   :  { %v2576_v28 = vpop.f32.mrb[20].mxu1  ;;  %v2542_v62 = vpop.f32.mrb[21].mxu0 }
 0x952   :  { %v2543_v15 = vadd.f32 %v2542_v62, %v2541_v45  ;;  %v2577_v21 = vpop.f32.mrb[21].mxu1 }
 0x953   :  { %v2578_v41 = vadd.f32 %v2577_v21, %v2576_v28 }
 0x955   :  { %v2011_v4 = vadd.f32 %v2578_v41, %v2543_v15 }
 0x970   :  { %v2611_v5 = vpop.f32.mrb[22].mxu0 }
 0x971   :  { %v2646_v23 = vpop.f32.mrb[22].mxu1  ;;  %v2612_v33 = vpop.f32.mrb[23].mxu0 }
 0x972   :  { %v2613_v30 = vadd.f32 %v2612_v33, %v2611_v5  ;;  %v2647_v32 = vpop.f32.mrb[23].mxu1 }
 0x973   :  { %v2648_v56 = vadd.f32 %v2647_v32, %v2646_v23 }
 0x974   :  { %v2081_v10 = vadd.f32 %v2613_v30, %v2011_v4 }
 0x976   :  { %v2151_v20 = vadd.f32 %v2648_v56, %v2081_v10 }
 0x978   :  { %v2154_v1 = vsel %vm889_vm0, %v2151_v20, -inf }
 0x979   :  { %2155 = vmax.xlane.f32.xlu0 %v2154_v1 }
 0xa06   :  { %v2156_v42 = vpop.xlane.xlu0 %2155 }
 0xa07   :  { %v2157_v18 = vsub.f32 %v2151_v20, %v2156_v42 }
 0xa09   :  { %v2158_v27 = vmul.f32 1.442695, %v2157_v18 }
 0xa0b   :  { %3507 = vpow2.f32 %v2158_v27 }
 0xa15   :  { %v3508_v31 = vpop.eup %3507 }
 0xa16   :  { %v2160_v35 = vsel %vm889_vm0, %v3508_v31, 0.0 }
 0xa17   :  { %2161 = vadd.xlane.f32.xlu1 %v2160_v35 }
 0xaa4   :  { %v2162_v39 = vpop.xlane.xlu1 %2161 }
 0xaa5   :  { %3509 = vrcp.f32 %v2162_v39 }
 0xaaf   :  { %v3510_v40 = vpop.eup %3509 }
 0xab0   :  { %v2164_v44 = vmul.f32 %v3510_v40, %v3508_v31 }
 0xab2   :  { %2173 = vperm.xlu1 %3443, %v2164_v44   ;;  %2167 = vperm.xlu0 %3442, %v2164_v44  }
 0xab6   :  { %3444 = vset.pattern.permute.xlu1 %v5701_v51  ;;  %3450 = vset.pattern.permute.xlu0 %v5630_v9 }
 0xab7   :  { %2179 = vperm.xlu1 %3444, %v2164_v44  }
 0xabb   :  { %3445 = vset.pattern.permute.xlu1 %v5626_v16 }
 0xabc   :  { %2185 = vperm.xlu1 %3445, %v2164_v44  }
 0xac0   :  { %3446 = vset.pattern.permute.xlu1 %v5627_v2 }
 0xac1   :  { %2191 = vperm.xlu1 %3446, %v2164_v44  }
 0xac5   :  { %3447 = vset.pattern.permute.xlu1 %v5628_v3 }
 0xac6   :  { %2197 = vperm.xlu1 %3447, %v2164_v44  }
 0xaca   :  { %3448 = vset.pattern.permute.xlu1 %v5629_v8 }
 0xacb   :  { %2203 = vperm.xlu1 %3448, %v2164_v44  }
 0xacf   :  { %3449 = vset.pattern.permute.xlu1 %v5630_v9 }
 0xad0   :  { %2209 = vperm.xlu1 %3449, %v2164_v44  }
 0xb31   :  { %v2174_v52 = vpop.permute.xlu1 %2173  ;;  %v2168_v57 = vpop.permute.xlu0 %2167 }
 0xb32   :  { %v2170_v19 = vmul.f32 %v5130_v47, %v2168_v57  ;;  %v2176_v2 = vmul.f32 %v5132_v50, %v2174_v52 }
 0xb34   :  { %v2171_v16 = vadd.f32 %v2170_v19, %v5054_v26 }
 0xb36   :  { %v2180_v53 = vpop.permute.xlu1 %2179  ;;  %v2177_v22 = vadd.f32 %v2176_v2, %v2171_v16 }
 0xb37   :  { %v2182_v3 = vmul.f32 %v5137_v46, %v2180_v53 }
 0xb39   :  { %v2183_v7 = vadd.f32 %v2182_v3, %v2177_v22 }
 0xb3b   :  { %v2186_v6 = vpop.permute.xlu1 %2185 }
 0xb3c   :  { %v2188_v8 = vmul.f32 %v5134_v13, %v2186_v6 }
 0xb3e   :  { %v2189_v29 = vadd.f32 %v2188_v8, %v2183_v7 }
 0xb40   :  { %v2192_v17 = vpop.permute.xlu1 %2191 }
 0xb41   :  { %v2194_v9 = vmul.f32 %v5174_v24, %v2192_v17 }
 0xb43   :  { %v2195_v49 = vadd.f32 %v2194_v9, %v2189_v29 }
 0xb45   :  { %v2198_v11 = vpop.permute.xlu1 %2197 }
 0xb46   :  { %v2200_v59 = vmul.f32 %v5177_v14, %v2198_v11 }
 0xb48   :  { %v2201_v26 = vadd.f32 %v2200_v59, %v2195_v49 }
 0xb4a   :  { %v2204_v58 = vpop.permute.xlu1 %2203 }
 0xb4b   :  { %v2206_v47 = vmul.f32 %v5183_v12, %v2204_v58 }
 0xb4d   :  { %v2207_v50 = vadd.f32 %v2206_v47, %v2201_v26 }
 0xb4f   :  { %v2210_v48 = vpop.permute.xlu1 %2209 }
 0xb50   :  { %v2212_v46 = vmul.f32 %v5180_v38, %v2210_v48 }
 0xb52   :  { %v2213_v61 = vadd.f32 %v2212_v46, %v2207_v50 }
 0xb54   :  { %2214 = vst [vmem:[#allocation2] sm:$0xff] %v2213_v61 }
 0xb55   :  { %3523 = shalt.err (!%p3520_p4)
}
 0xb56   :  { %s3524_s27 = scalar_lea.hbm %s5222_s4, 128 }
 0xb57   :  { %p3525_p5 = scmp.ne.s32.totalorder %s5222_s4, %s3524_s27  ;;  %p3528_p6 = scmp.lt.u32.totalorder %s3524_s27, %s5222_s4 }
 0xb59   :  { %p3530_p7 = pnand %p3528_p6, %p3525_p5 }
 0xb5b   :  { %3533 = shalt.err (!%p3530_p7)
}
 0xb5c   :  { %2224 = dma.vmem_to_hbm [thread:$0]  %s2222_s23, 128, %s5222_s4, [#allocation3]  }
 0xb5d   :  { %3534 = dma.done.wait [#allocation3], 128  }
 0xb5e   :  { %3535 = vsyncadd [#allocation3], 4294967168 }
 0xb5f   :  { %2228 = vsyncpa [#allocation3], 1 }

</bundles_post_ra>
